<compile_context>
chip_gen: v5e
topology: v5e:2x2
jax: 0.10.0
libtpu: 0.0.40
codegen_flags: <defaults>
</compile_context>

<pallas_src>
import math

import jax
import jax.numpy as jnp
import numpy as np
from jax.experimental import pallas as pl
from jax.experimental.pallas import tpu as pltpu


# ----------------------------------------------------------------------------
# Fused BasicBlock kernel
# ----------------------------------------------------------------------------
def _make_block_kernel(H, W, Cin, Cout, stride, equal_in_out):
    """Kernel computing one full BasicBlock for one image.

    Input x is NHWC for stride==1 and channel-pair packed (H, W/2, 2*Cin) for
    stride==2.  Conv weights arrive pre-reshaped to (9*C, Cout); the 1x1
    shortcut weight to (Cin, Cout)."""
    Ho, Wo = H // stride, W // stride

    def taps_stride1(a, Ha, Wa, C):
        # 3x3 / pad=1 / stride=1 im2col taps; padding built in VMEM.
        zr = jnp.zeros((1, Wa, C), jnp.float32)
        ap = jnp.concatenate([zr, a, zr], axis=0)          # pad H
        zc = jnp.zeros((Ha + 2, 1, C), jnp.float32)
        ap = jnp.concatenate([zc, ap, zc], axis=1)         # pad W
        return [ap[kh:kh + Ha, kw:kw + Wa, :]
                for kh in range(3) for kw in range(3)]

    def kernel(x_ref, s1_ref, b1_ref, w1_ref, s2_ref, b2_ref, w2_ref, *rest):
        if equal_in_out:
            (o_ref,) = rest
        else:
            wsc_ref, o_ref = rest

        xin = x_ref[0]                                     # (H, W, Cin) or packed
        # ---- BN1 + ReLU, fused (VPU) ----
        a = jnp.maximum(xin * s1_ref[...] + b1_ref[...], 0.0)

        # ---- im2col taps of conv1 (pad=1, stride=s), built fully in VMEM ----
        if stride == 1:
            taps1 = taps_stride1(a, H, W, Cin)
        else:
            # `a` is channel-pair packed: a[h, wp, j*Cin + c] == act[h, 2*wp+j, c]
            W2 = W // 2
            zr = jnp.zeros((1, W2, 2 * Cin), jnp.float32)
            a2p = jnp.concatenate([zr, a, zr], axis=0)     # (H+2, W2, 2Cin)
            a3 = a2p.reshape(Ho + 1, 2, W2, 2 * Cin)       # leading-dim split only
            zc = jnp.zeros((Ho + 1, 2, 1, 2 * Cin), jnp.float32)
            a4 = jnp.concatenate([zc, a3], axis=2)         # (Ho+1, 2, W2+1, 2Cin)
            # tap(kh, kw)[ho, wo, c] == act_pad[2*ho + kh, 2*wo + kw, c]
            hsel = ((0, 0), (0, 1), (1, 0))                # kh -> (row0, pair idx)
            wsel = ((0, Cin), (1, 0), (1, Cin))            # kw -> (col0, lane off)
            taps1 = []
            for kh in range(3):
                h0, hi = hsel[kh]
                for kw in range(3):
                    w0, c0 = wsel[kw]
                    taps1.append(a4[h0:h0 + Ho, hi, w0:w0 + Wo, c0:c0 + Cin])

        # ---- conv1 as ONE matmul, K = 9*Cin ----
        p1 = jnp.concatenate(taps1, axis=-1).reshape(Ho * Wo, 9 * Cin)
        h = jnp.dot(p1, w1_ref[...], preferred_element_type=jnp.float32)

        # ---- BN2 + ReLU, fused.  (dropout: dropRate == 0.0 -> no-op) ----
        b = jnp.maximum(h * s2_ref[...] + b2_ref[...], 0.0)

        # ---- conv2 (pad=1, stride=1) as ONE matmul, K = 9*Cout ----
        taps2 = taps_stride1(b.reshape(Ho, Wo, Cout), Ho, Wo, Cout)
        p2 = jnp.concatenate(taps2, axis=-1).reshape(Ho * Wo, 9 * Cout)
        out = jnp.dot(p2, w2_ref[...], preferred_element_type=jnp.float32)

        # ---- fused shortcut / residual add ----
        if equal_in_out:
            out = out + xin.reshape(Ho * Wo, Cout)
        else:
            # centre tap == a[::stride, ::stride, :] -> fused 1x1 shortcut conv.
            a_c = taps1[4].reshape(Ho * Wo, Cin)
            out = out + jnp.dot(a_c, wsc_ref[...],
                                preferred_element_type=jnp.float32)

        o_ref[...] = out.reshape(1, Ho, Wo, Cout).astype(o_ref.dtype)

    return kernel


# ----------------------------------------------------------------------------
# Wrappers (NHWC internally, NCHW at the module boundary)
# ----------------------------------------------------------------------------
def basic_block_forward(x, p, stride):
    """Fully fused WideResNet BasicBlock.  x: (N, H, W, Cin) NHWC float32."""
    N, H, W, Cin = x.shape
    Cout = p["conv1_w"].shape[-1]
    equal_in_out = bool(p["equal_in_out"])
    assert stride in (1, 2)
    assert not (equal_in_out and stride != 1), "identity shortcut needs stride 1"
    Ho, Wo = H // stride, W // stride

    s1 = p["bn1_scale"].astype(jnp.float32)
    b1 = p["bn1_shift"].astype(jnp.float32)
    if stride == 2:
        assert H % 2 == 0 and W % 2 == 0
        # Channel-pair pack W (free contiguous reshape) so the strided conv
        # needs no strided sublane loads inside the kernel.
        x_in = x.reshape(N, H, W // 2, 2 * Cin)
        s1 = jnp.tile(s1, 2)
        b1 = jnp.tile(b1, 2)
        x_block = (1, H, W // 2, 2 * Cin)
        c1 = 2 * Cin
    else:
        x_in = x
        x_block = (1, H, W, Cin)
        c1 = Cin

    s1 = s1.reshape(1, c1)
    b1 = b1.reshape(1, c1)
    s2 = p["bn2_scale"].reshape(1, Cout).astype(jnp.float32)
    b2 = p["bn2_shift"].reshape(1, Cout).astype(jnp.float32)
    w1 = p["conv1_w"].reshape(9 * Cin, Cout).astype(jnp.float32)   # (kh,kw,ci) major
    w2 = p["conv2_w"].reshape(9 * Cout, Cout).astype(jnp.float32)

    in_specs = [
        pl.BlockSpec(x_block, lambda n: (n, 0, 0, 0)),
        pl.BlockSpec((1, c1), lambda n: (0, 0)),
        pl.BlockSpec((1, c1), lambda n: (0, 0)),
        pl.BlockSpec((9 * Cin, Cout), lambda n: (0, 0)),
        pl.BlockSpec((1, Cout), lambda n: (0, 0)),
        pl.BlockSpec((1, Cout), lambda n: (0, 0)),
        pl.BlockSpec((9 * Cout, Cout), lambda n: (0, 0)),
    ]
    args = [x_in, s1, b1, w1, s2, b2, w2]
    if not equal_in_out:
        wsc = p["conv_sc_w"].reshape(Cin, Cout).astype(jnp.float32)
        in_specs.append(pl.BlockSpec((Cin, Cout), lambda n: (0, 0)))
        args.append(wsc)

    return pl.pallas_call(
        _make_block_kernel(H, W, Cin, Cout, stride, equal_in_out),
        out_shape=jax.ShapeDtypeStruct((N, Ho, Wo, Cout), jnp.float32),
        grid=(N,),
        in_specs=in_specs,
        out_specs=pl.BlockSpec((1, Ho, Wo, Cout), lambda n: (n, 0, 0, 0)),
        compiler_params=pltpu.CompilerParams(
            dimension_semantics=("parallel",)),
    )(*args)


def network_block_forward(x_nchw, layer_params, stride):
    x = jnp.transpose(x_nchw, (0, 2, 3, 1))           # NCHW -> NHWC
    for i, p in enumerate(layer_params):
        x = basic_block_forward(x, p, stride if i == 0 else 1)
    return jnp.transpose(x, (0, 3, 1, 2))             # NHWC -> NCHW


# ----------------------------------------------------------------------------
# Deterministic parameter init (BN running stats folded into scale/shift)
# ----------------------------------------------------------------------------
def _bn_params(k, c, eps=1e-5):
    k1, k2, k3, k4 = jax.random.split(k, 4)
    gamma = 1.0 + 0.1 * jax.random.normal(k1, (c,), jnp.float32)
    beta = 0.1 * jax.random.normal(k2, (c,), jnp.float32)
    mean = 0.1 * jax.random.normal(k3, (c,), jnp.float32)
    var = jax.random.uniform(k4, (c,), jnp.float32, 0.5, 1.5)
    scale = gamma / jnp.sqrt(var + eps)
    shift = beta - mean * scale
    return scale, shift


def _conv_w(k, kh, kw, cin, cout):
    std = math.sqrt(2.0 / (kh * kw * cout))
    return std * jax.random.normal(k, (kh, kw, cin, cout), jnp.float32)


def init_network_block_params(key, nb_layers, in_planes, out_planes):
    params = []
    for i in range(nb_layers):
        cin = in_planes if i == 0 else out_planes
        cout = out_planes
        key, kb1, kb2, kc1, kc2, ksc = jax.random.split(key, 6)
        s1, b1 = _bn_params(kb1, cin)
        s2, b2 = _bn_params(kb2, cout)
        p = {
            "equal_in_out": cin == cout,
            "bn1_scale": s1, "bn1_shift": b1,
            "bn2_scale": s2, "bn2_shift": b2,
            "conv1_w": _conv_w(kc1, 3, 3, cin, cout),
            "conv2_w": _conv_w(kc2, 3, 3, cout, cout),
            "conv_sc_w": None if cin == cout else _conv_w(ksc, 1, 1, cin, cout),
        }
        params.append(p)
    return params


# ----------------------------------------------------------------------------
# Pure-JAX reference (NCHW, mirrors the PyTorch module) for verification
# ----------------------------------------------------------------------------
def _conv_ref_nchw(x, w_hwio, stride, padding):
    w = jnp.transpose(w_hwio, (3, 2, 0, 1))           # HWIO -> OIHW
    return jax.lax.conv_general_dilated(
        x, w, (stride, stride), ((padding, padding), (padding, padding)),
        dimension_numbers=("NCHW", "OIHW", "NCHW"),
        precision=jax.lax.Precision.HIGHEST)


def _bn_relu_ref_nchw(x, scale, shift):
    return jnp.maximum(
        x * scale[None, :, None, None] + shift[None, :, None, None], 0.0)


def network_block_ref(x, layer_params, stride):
    for i, p in enumerate(layer_params):
        s = stride if i == 0 else 1
        a = _bn_relu_ref_nchw(x, p["bn1_scale"], p["bn1_shift"])
        h = _conv_ref_nchw(a, p["conv1_w"], s, 1)
        b = _bn_relu_ref_nchw(h, p["bn2_scale"], p["bn2_shift"])
        h2 = _conv_ref_nchw(b, p["conv2_w"], 1, 1)
        res = x if p["equal_in_out"] else _conv_ref_nchw(a, p["conv_sc_w"], s, 0)
        x = h2 + res
    return x


# ----------------------------------------------------------------------------
if __name__ == "__main__":
    key = jax.random.PRNGKey(0)
    N, C_in, H, W = 2, 4, 16, 16

    key, kx, kp1, kp2 = jax.random.split(key, 4)
    x = jax.random.normal(kx, (N, C_in, H, W), jnp.float32)   # NCHW like PyTorch

    # Main config: nb_layers=2, channel change 4 -> 8, stride 2
    # (covers stride-2 conv + 1x1 shortcut, and stride-1 identity-residual block).
    nb_layers, out_planes, stride = 2, 8, 2
    params = init_network_block_params(kp1, nb_layers, C_in, out_planes)
    y = jax.block_until_ready(network_block_forward(x, params, stride))
    y_ref = network_block_ref(x, params, stride)
    np.testing.assert_allclose(np.asarray(y), np.asarray(y_ref),
                               rtol=1e-2, atol=1e-2)
    assert y.shape == (N, out_planes, H // stride, W // stride)

    # Secondary config: stride 1 with channel change (1x1 shortcut at stride 1),
    # as in the first NetworkBlock of a WideResNet.
    params_s1 = init_network_block_params(kp2, 1, C_in, out_planes)
    y1 = jax.block_until_ready(network_block_forward(x, params_s1, 1))
    y1_ref = network_block_ref(x, params_s1, 1)
    np.testing.assert_allclose(np.asarray(y1), np.asarray(y1_ref),
                               rtol=1e-2, atol=1e-2)
    assert y1.shape == (N, out_planes, H, W)

    print("KERNEL_OK")
</pallas_src>

<mosaic_0001>
module attributes {stable_mosaic.version = 11 : i64} {
  func.func @kernel(%arg0: i32, %arg1: memref<1x16x8x8xf32, #tpu.memory_space<vmem>>, %arg2: memref<1x8xf32, #tpu.memory_space<vmem>>, %arg3: memref<1x8xf32, #tpu.memory_space<vmem>>, %arg4: memref<36x8xf32, #tpu.memory_space<vmem>>, %arg5: memref<1x8xf32, #tpu.memory_space<vmem>>, %arg6: memref<1x8xf32, #tpu.memory_space<vmem>>, %arg7: memref<72x8xf32, #tpu.memory_space<vmem>>, %arg8: memref<4x8xf32, #tpu.memory_space<vmem>>, %arg9: memref<1x8x8x8xf32, #tpu.memory_space<vmem>>) attributes {dimension_semantics = [#tpu.dimension_semantics<parallel>], iteration_bounds = array<i64: 2>, scalar_prefetch = 0 : i64, scratch_operands = 0 : i64, tpu.core_type = #tpu.core_type<tc>, window_params = [{transform_indices = @transform_0, window_bounds = array<i64: 1, 16, 8, 8>}, {pipeline_mode = #tpu.pipeline_mode<synchronous>, transform_indices = @transform_1, window_bounds = array<i64: 1, 8>}, {pipeline_mode = #tpu.pipeline_mode<synchronous>, transform_indices = @transform_2, window_bounds = array<i64: 1, 8>}, {pipeline_mode = #tpu.pipeline_mode<synchronous>, transform_indices = @transform_3, window_bounds = array<i64: 36, 8>}, {pipeline_mode = #tpu.pipeline_mode<synchronous>, transform_indices = @transform_4, window_bounds = array<i64: 1, 8>}, {pipeline_mode = #tpu.pipeline_mode<synchronous>, transform_indices = @transform_5, window_bounds = array<i64: 1, 8>}, {pipeline_mode = #tpu.pipeline_mode<synchronous>, transform_indices = @transform_6, window_bounds = array<i64: 72, 8>}, {pipeline_mode = #tpu.pipeline_mode<synchronous>, transform_indices = @transform_7, window_bounds = array<i64: 4, 8>}, {transform_indices = @transform_8, window_bounds = array<i64: 1, 8, 8, 8>}]} {
    %c0 = arith.constant 0 : index
    %c0_0 = arith.constant 0 : index
    %c0_1 = arith.constant 0 : index
    %c0_2 = arith.constant 0 : index
    %0 = vector.load %arg1[%c0, %c0_0, %c0_1, %c0_2] : memref<1x16x8x8xf32, #tpu.memory_space<vmem>>, vector<1x16x8x8xf32>
    %1 = vector.shape_cast %0 : vector<1x16x8x8xf32> to vector<16x8x8xf32>
    %c0_3 = arith.constant 0 : index
    %c0_4 = arith.constant 0 : index
    %2 = vector.load %arg2[%c0_3, %c0_4] : memref<1x8xf32, #tpu.memory_space<vmem>>, vector<1x8xf32>
    %3 = vector.shape_cast %2 : vector<1x8xf32> to vector<1x1x8xf32>
    %4 = vector.broadcast %3 : vector<1x1x8xf32> to vector<16x8x8xf32>
    %5 = arith.mulf %1, %4 : vector<16x8x8xf32>
    %c0_5 = arith.constant 0 : index
    %c0_6 = arith.constant 0 : index
    %6 = vector.load %arg3[%c0_5, %c0_6] : memref<1x8xf32, #tpu.memory_space<vmem>>, vector<1x8xf32>
    %7 = vector.shape_cast %6 : vector<1x8xf32> to vector<1x1x8xf32>
    %8 = vector.broadcast %7 : vector<1x1x8xf32> to vector<16x8x8xf32>
    %9 = arith.addf %5, %8 : vector<16x8x8xf32>
    %cst = arith.constant 0.000000e+00 : f32
    %10 = vector.broadcast %cst : f32 to vector<16x8x8xf32>
    %11 = arith.maximumf %9, %10 : vector<16x8x8xf32>
    %cst_7 = arith.constant 0.000000e+00 : f32
    %12 = vector.broadcast %cst_7 : f32 to vector<1x8x8xf32>
    %13 = tpu.concatenate %12, %11, %12 in 0 : vector<1x8x8xf32>, vector<16x8x8xf32>, vector<1x8x8xf32> -> vector<18x8x8xf32>
    %14 = vector.shape_cast %13 : vector<18x8x8xf32> to vector<9x2x8x8xf32>
    %cst_8 = arith.constant 0.000000e+00 : f32
    %15 = vector.broadcast %cst_8 : f32 to vector<9x2x1x8xf32>
    %16 = tpu.concatenate %15, %14 in 2 : vector<9x2x1x8xf32>, vector<9x2x8x8xf32> -> vector<9x2x9x8xf32>
    %17 = vector.extract_strided_slice %16 {offsets = [0, 0, 0, 4], sizes = [8, 1, 8, 4], strides = [1, 1, 1, 1]} : vector<9x2x9x8xf32> to vector<8x1x8x4xf32>
    %18 = vector.shape_cast %17 : vector<8x1x8x4xf32> to vector<8x8x4xf32>
    %19 = vector.extract_strided_slice %16 {offsets = [0, 0, 1, 0], sizes = [8, 1, 8, 4], strides = [1, 1, 1, 1]} : vector<9x2x9x8xf32> to vector<8x1x8x4xf32>
    %20 = vector.shape_cast %19 : vector<8x1x8x4xf32> to vector<8x8x4xf32>
    %21 = vector.extract_strided_slice %16 {offsets = [0, 0, 1, 4], sizes = [8, 1, 8, 4], strides = [1, 1, 1, 1]} : vector<9x2x9x8xf32> to vector<8x1x8x4xf32>
    %22 = vector.shape_cast %21 : vector<8x1x8x4xf32> to vector<8x8x4xf32>
    %23 = vector.extract_strided_slice %16 {offsets = [0, 1, 0, 4], sizes = [8, 1, 8, 4], strides = [1, 1, 1, 1]} : vector<9x2x9x8xf32> to vector<8x1x8x4xf32>
    %24 = vector.shape_cast %23 : vector<8x1x8x4xf32> to vector<8x8x4xf32>
    %25 = vector.extract_strided_slice %16 {offsets = [0, 1, 1, 0], sizes = [8, 1, 8, 4], strides = [1, 1, 1, 1]} : vector<9x2x9x8xf32> to vector<8x1x8x4xf32>
    %26 = vector.shape_cast %25 : vector<8x1x8x4xf32> to vector<8x8x4xf32>
    %27 = vector.extract_strided_slice %16 {offsets = [0, 1, 1, 4], sizes = [8, 1, 8, 4], strides = [1, 1, 1, 1]} : vector<9x2x9x8xf32> to vector<8x1x8x4xf32>
    %28 = vector.shape_cast %27 : vector<8x1x8x4xf32> to vector<8x8x4xf32>
    %29 = vector.extract_strided_slice %16 {offsets = [1, 0, 0, 4], sizes = [8, 1, 8, 4], strides = [1, 1, 1, 1]} : vector<9x2x9x8xf32> to vector<8x1x8x4xf32>
    %30 = vector.shape_cast %29 : vector<8x1x8x4xf32> to vector<8x8x4xf32>
    %31 = vector.extract_strided_slice %16 {offsets = [1, 0, 1, 0], sizes = [8, 1, 8, 4], strides = [1, 1, 1, 1]} : vector<9x2x9x8xf32> to vector<8x1x8x4xf32>
    %32 = vector.shape_cast %31 : vector<8x1x8x4xf32> to vector<8x8x4xf32>
    %33 = vector.extract_strided_slice %16 {offsets = [1, 0, 1, 4], sizes = [8, 1, 8, 4], strides = [1, 1, 1, 1]} : vector<9x2x9x8xf32> to vector<8x1x8x4xf32>
    %34 = vector.shape_cast %33 : vector<8x1x8x4xf32> to vector<8x8x4xf32>
    %35 = tpu.concatenate %18, %20, %22, %24, %26, %28, %30, %32, %34 in 2 : vector<8x8x4xf32>, vector<8x8x4xf32>, vector<8x8x4xf32>, vector<8x8x4xf32>, vector<8x8x4xf32>, vector<8x8x4xf32>, vector<8x8x4xf32>, vector<8x8x4xf32>, vector<8x8x4xf32> -> vector<8x8x36xf32>
    %36 = vector.shape_cast %35 : vector<8x8x36xf32> to vector<64x36xf32>
    %c0_9 = arith.constant 0 : index
    %c0_10 = arith.constant 0 : index
    %37 = vector.load %arg4[%c0_9, %c0_10] : memref<36x8xf32, #tpu.memory_space<vmem>>, vector<36x8xf32>
    %cst_11 = arith.constant dense<0.000000e+00> : vector<64x8xf32>
    %38 = tpu.matmul %36, %37, %cst_11 {dimension_numbers = #tpu.dot_dimension_numbers<[1], [0], [0], [1], [0, 0, 1, 1], [], []>} : vector<64x36xf32>, vector<36x8xf32>, vector<64x8xf32> -> vector<64x8xf32>
    %c0_12 = arith.constant 0 : index
    %c0_13 = arith.constant 0 : index
    %39 = vector.load %arg5[%c0_12, %c0_13] : memref<1x8xf32, #tpu.memory_space<vmem>>, vector<1x8xf32>
    %40 = vector.broadcast %39 : vector<1x8xf32> to vector<64x8xf32>
    %41 = arith.mulf %38, %40 : vector<64x8xf32>
    %c0_14 = arith.constant 0 : index
    %c0_15 = arith.constant 0 : index
    %42 = vector.load %arg6[%c0_14, %c0_15] : memref<1x8xf32, #tpu.memory_space<vmem>>, vector<1x8xf32>
    %43 = vector.broadcast %42 : vector<1x8xf32> to vector<64x8xf32>
    %44 = arith.addf %41, %43 : vector<64x8xf32>
    %cst_16 = arith.constant 0.000000e+00 : f32
    %45 = vector.broadcast %cst_16 : f32 to vector<64x8xf32>
    %46 = arith.maximumf %44, %45 : vector<64x8xf32>
    %47 = vector.shape_cast %46 : vector<64x8xf32> to vector<8x8x8xf32>
    %cst_17 = arith.constant 0.000000e+00 : f32
    %48 = vector.broadcast %cst_17 : f32 to vector<1x8x8xf32>
    %49 = tpu.concatenate %48, %47, %48 in 0 : vector<1x8x8xf32>, vector<8x8x8xf32>, vector<1x8x8xf32> -> vector<10x8x8xf32>
    %cst_18 = arith.constant 0.000000e+00 : f32
    %50 = vector.broadcast %cst_18 : f32 to vector<10x1x8xf32>
    %51 = tpu.concatenate %50, %49, %50 in 1 : vector<10x1x8xf32>, vector<10x8x8xf32>, vector<10x1x8xf32> -> vector<10x10x8xf32>
    %52 = vector.extract_strided_slice %51 {offsets = [0, 0, 0], sizes = [8, 8, 8], strides = [1, 1, 1]} : vector<10x10x8xf32> to vector<8x8x8xf32>
    %53 = vector.extract_strided_slice %51 {offsets = [0, 1, 0], sizes = [8, 8, 8], strides = [1, 1, 1]} : vector<10x10x8xf32> to vector<8x8x8xf32>
    %54 = vector.extract_strided_slice %51 {offsets = [0, 2, 0], sizes = [8, 8, 8], strides = [1, 1, 1]} : vector<10x10x8xf32> to vector<8x8x8xf32>
    %55 = vector.extract_strided_slice %51 {offsets = [1, 0, 0], sizes = [8, 8, 8], strides = [1, 1, 1]} : vector<10x10x8xf32> to vector<8x8x8xf32>
    %56 = vector.extract_strided_slice %51 {offsets = [1, 1, 0], sizes = [8, 8, 8], strides = [1, 1, 1]} : vector<10x10x8xf32> to vector<8x8x8xf32>
    %57 = vector.extract_strided_slice %51 {offsets = [1, 2, 0], sizes = [8, 8, 8], strides = [1, 1, 1]} : vector<10x10x8xf32> to vector<8x8x8xf32>
    %58 = vector.extract_strided_slice %51 {offsets = [2, 0, 0], sizes = [8, 8, 8], strides = [1, 1, 1]} : vector<10x10x8xf32> to vector<8x8x8xf32>
    %59 = vector.extract_strided_slice %51 {offsets = [2, 1, 0], sizes = [8, 8, 8], strides = [1, 1, 1]} : vector<10x10x8xf32> to vector<8x8x8xf32>
    %60 = vector.extract_strided_slice %51 {offsets = [2, 2, 0], sizes = [8, 8, 8], strides = [1, 1, 1]} : vector<10x10x8xf32> to vector<8x8x8xf32>
    %61 = tpu.concatenate %52, %53, %54, %55, %56, %57, %58, %59, %60 in 2 : vector<8x8x8xf32>, vector<8x8x8xf32>, vector<8x8x8xf32>, vector<8x8x8xf32>, vector<8x8x8xf32>, vector<8x8x8xf32>, vector<8x8x8xf32>, vector<8x8x8xf32>, vector<8x8x8xf32> -> vector<8x8x72xf32>
    %62 = vector.shape_cast %61 : vector<8x8x72xf32> to vector<64x72xf32>
    %c0_19 = arith.constant 0 : index
    %c0_20 = arith.constant 0 : index
    %63 = vector.load %arg7[%c0_19, %c0_20] : memref<72x8xf32, #tpu.memory_space<vmem>>, vector<72x8xf32>
    %cst_21 = arith.constant dense<0.000000e+00> : vector<64x8xf32>
    %64 = tpu.matmul %62, %63, %cst_21 {dimension_numbers = #tpu.dot_dimension_numbers<[1], [0], [0], [1], [0, 0, 1, 1], [], []>} : vector<64x72xf32>, vector<72x8xf32>, vector<64x8xf32> -> vector<64x8xf32>
    %65 = vector.shape_cast %26 : vector<8x8x4xf32> to vector<64x4xf32>
    %c0_22 = arith.constant 0 : index
    %c0_23 = arith.constant 0 : index
    %66 = vector.load %arg8[%c0_22, %c0_23] : memref<4x8xf32, #tpu.memory_space<vmem>>, vector<4x8xf32>
    %cst_24 = arith.constant dense<0.000000e+00> : vector<64x8xf32>
    %67 = tpu.matmul %65, %66, %cst_24 {dimension_numbers = #tpu.dot_dimension_numbers<[1], [0], [0], [1], [0, 0, 1, 1], [], []>} : vector<64x4xf32>, vector<4x8xf32>, vector<64x8xf32> -> vector<64x8xf32>
    %68 = arith.addf %64, %67 : vector<64x8xf32>
    %69 = vector.shape_cast %68 : vector<64x8xf32> to vector<1x8x8x8xf32>
    %c0_25 = arith.constant 0 : index
    %c0_26 = arith.constant 0 : index
    %c0_27 = arith.constant 0 : index
    %c0_28 = arith.constant 0 : index
    %70 = vector.load %arg9[%c0_25, %c0_26, %c0_27, %c0_28] : memref<1x8x8x8xf32, #tpu.memory_space<vmem>>, vector<1x8x8x8xf32>
    tpu.vector_store %arg9[%c0_25, %c0_26, %c0_27, %c0_28], %69 {strides = array<i32>} : memref<1x8x8x8xf32, #tpu.memory_space<vmem>>, vector<1x8x8x8xf32>,
    return
  }
  func.func @transform_0(%arg0: i32) -> (i32, i32, i32, i32) {
    %c0_i32 = arith.constant 0 : i32
    %c0_i32_0 = arith.constant 0 : i32
    %c0_i32_1 = arith.constant 0 : i32
    %c0_i32_2 = arith.constant 0 : i32
    return %arg0, %c0_i32, %c0_i32_0, %c0_i32_1 : i32, i32, i32, i32
  }
  func.func @transform_1(%arg0: i32) -> (i32, i32) {
    %c0_i32 = arith.constant 0 : i32
    %c0_i32_0 = arith.constant 0 : i32
    %c0_i32_1 = arith.constant 0 : i32
    return %c0_i32, %c0_i32_0 : i32, i32
  }
  func.func @transform_2(%arg0: i32) -> (i32, i32) {
    %c0_i32 = arith.constant 0 : i32
    %c0_i32_0 = arith.constant 0 : i32
    %c0_i32_1 = arith.constant 0 : i32
    return %c0_i32, %c0_i32_0 : i32, i32
  }
  func.func @transform_3(%arg0: i32) -> (i32, i32) {
    %c0_i32 = arith.constant 0 : i32
    %c0_i32_0 = arith.constant 0 : i32
    %c0_i32_1 = arith.constant 0 : i32
    return %c0_i32, %c0_i32_0 : i32, i32
  }
  func.func @transform_4(%arg0: i32) -> (i32, i32) {
    %c0_i32 = arith.constant 0 : i32
    %c0_i32_0 = arith.constant 0 : i32
    %c0_i32_1 = arith.constant 0 : i32
    return %c0_i32, %c0_i32_0 : i32, i32
  }
  func.func @transform_5(%arg0: i32) -> (i32, i32) {
    %c0_i32 = arith.constant 0 : i32
    %c0_i32_0 = arith.constant 0 : i32
    %c0_i32_1 = arith.constant 0 : i32
    return %c0_i32, %c0_i32_0 : i32, i32
  }
  func.func @transform_6(%arg0: i32) -> (i32, i32) {
    %c0_i32 = arith.constant 0 : i32
    %c0_i32_0 = arith.constant 0 : i32
    %c0_i32_1 = arith.constant 0 : i32
    return %c0_i32, %c0_i32_0 : i32, i32
  }
  func.func @transform_7(%arg0: i32) -> (i32, i32) {
    %c0_i32 = arith.constant 0 : i32
    %c0_i32_0 = arith.constant 0 : i32
    %c0_i32_1 = arith.constant 0 : i32
    return %c0_i32, %c0_i32_0 : i32, i32
  }
  func.func @transform_8(%arg0: i32) -> (i32, i32, i32, i32) {
    %c0_i32 = arith.constant 0 : i32
    %c0_i32_0 = arith.constant 0 : i32
    %c0_i32_1 = arith.constant 0 : i32
    %c0_i32_2 = arith.constant 0 : i32
    return %arg0, %c0_i32, %c0_i32_0, %c0_i32_1 : i32, i32, i32, i32
  }
}

</mosaic_0001>

<bundles_post_ra>
// kernel: tpu_custom_call.1
= control target key start
LH: loop header
LB: loop body
LE: loop exit
PB: predicated region body
PF: predicated region fallthrough
CT: control target
= control target key end

     0   :  { %13 = vsyncpa [#allocation3], 0  ;;  %s2354_s0 = inlined_call_operand.vmem [shape: f32[2,16,8,8], index: 0, kind: input, shape index: {}]   ;;  %s2355_s1 = inlined_call_operand.vmem [shape: f32[1,8], index: 1, kind: input, shape index: {}]   ;;  %s2356_s2 = inlined_call_operand.vmem [shape: f32[1,8], index: 2, kind: input, shape index: {}]   ;;  %s2357_s3 = inlined_call_operand.vmem [shape: f32[36,8], index: 3, kind: input, shape index: {}]   ;;  %s2358_s4 = inlined_call_operand.vmem [shape: f32[1,8], index: 4, kind: input, shape index: {}]   ;;  %s2359_s5 = inlined_call_operand.vmem [shape: f32[1,8], index: 5, kind: input, shape index: {}]   ;;  %s2360_s6 = inlined_call_operand.vmem [shape: f32[72,8], index: 6, kind: input, shape index: {}]   ;;  %s2361_s7 = inlined_call_operand.vmem [shape: f32[4,8], index: 7, kind: input, shape index: {}]   ;;  %s2362_s8 = inlined_call_operand.hbm [shape: f32[2,8,8,8], index: 8, kind: output, shape index: {}]  }
   0x1   :  { %15 = vsyncpa [#allocation3 + $0x1], 0  ;;  %s1660_s27 = smov 0   ;;  %s1662_s28 = smov 0  }
   0x2   :  { %s1664_s29 = smov 0   ;;  %s1666_s30 = smov 0  }
   0x3 LB: > { %s1681_s9 = sadd.s32 4294967295, %s1599_s30   ;;  %s1431_s10 = sadd.s32 4294967294, %s1599_s30   ;;  %s1599_s30 = sphi %s1666_s30, %s2371_s30   ;;  %s1595_s29 = sphi %s1664_s29, %s2370_s29   ;;  %s1591_s28 = sphi %s1662_s28, %s2369_s28   ;;  %s1587_s27 = sphi %s1660_s27, %s2368_s27  }
   0x4   : > { %s1685_s11 = sadd.s32 1, %s1599_s30   ;;  %s201_s12 = sadd.s32 1, %s1595_s29 }
   0x5   : > { %s198_s13 = ssub.s32 %s1599_s30, %s1685_s11  ;;  %p211_p0 = scmp.ne.s32.totalorder %s1595_s29, %s1591_s28 }
   0x6   : > { %p199_p1 = scmp.eq.s32.totalorder %s198_s13, 0  ;;  %p212_p2 = scmp.eq.s32.totalorder %s1681_s9, 1 }
   0x7   : > { %p217_p3 = scmp.ne.s32.totalorder %s1591_s28, %s1587_s27  ;;  %p218_p4 = scmp.eq.s32.totalorder %s1431_s10, 1 }
   0x8   : > { %s1696_s14 = scalar_select %p199_p1, %s1595_s29, %s201_s12  }
   0x9   : > { %p1698_p5 = por %p212_p2, %p211_p0  ;;  %p1702_p6 = por %p218_p4, %p217_p3 }
   0xa   : > { %p1434_p7 = scmp.ge.s32.totalorder %s1599_s30, 1  ;;  %p265_p8 = scmp.lt.s32.totalorder %s1599_s30, 3 }
   0xc   : > { %p266_p9 = pnand %p1434_p7, %p265_p8 }
   0xd   : > { %p299_p10 = scmp.lt.s32.totalorder (!%p266_p9), %s1681_s9, 1  ;;  %s1602_s18 = smov (!%p266_p9), 124  }
   0xe   : > { %269 = sbr.rel (%p266_p9) target bundleno = 713 (0x2c9), region = 52  ;;  %s1603_s10 = smov (!%p266_p9), 4  }
   0xf   : > { %s1604_s12 = smov (!%p266_p9), 8   ;;  %s1605_s13 = smov (!%p266_p9), 20  }
  0x10   : > { %s1607_s19 = smov (!%p266_p9), 28   ;;  %s1609_s25 = smov (!%p266_p9), 24  }
  0x11   : > { %s1610_s26 = smov (!%p266_p9), 40   ;;  %s1611_s20 = smov (!%p266_p9), 32  }
  0x12   : > { %s1613_s22 = smov (!%p266_p9), 64  }
  0x13   : > { %vm427_vm0 = vcmask 1040384   ;;  %v1601_v0 = vmov 0.0   ;;  %s300_s17 = scalar_select %p299_p10, %s1681_s9, 1  ;;  %v1721_v3 = vld [vmem:[%s2355_s1] ss:$0 sm:$0xff]  ;;  %vm477_vm1 = vcmask 1046528  }
  0x14   : > { %v1708_v1 = vrot.slane %v1601_v0, 7  ;;  %v1733_v6 = vld [vmem:[%s2356_s2] ss:$0 sm:$0xff]  ;;  %vm760_vm2 = vcmask 1043456   ;;  %vm658_vm3 = vcmask 31744   ;;  %vm667_vm4 = vcmask 64512  }
  0x15   : > { %s1469_s21 = sshll.u32 %s300_s17, 7  ;;  %s1606_s17 = smov 16   ;;  %vm676_vm5 = vcmask 97280   ;;  %vm685_vm6 = vcmask 130048   ;;  %vm694_vm7 = vcmask 162816   ;;  %vm703_vm8 = vcmask 195584  }
  0x16   : > { %v1713_v2 = vsel %vm427_vm0, 0.0, %v1708_v1  ;;  %v479_v5 = vrot.slane %v1708_v1, 1  ;;  %s1728_s24 = scalar_lea.vmem %s2354_s0, %s1469_s21  ;;  %vm712_vm9 = vcmask 228352   ;;  %vm721_vm10 = vcmask 261120   ;;  %s2363_s21 = smov 56  }
  0x17   : > { %453 = vrot.lane.b32.xlu0 %v1713_v2, %s1602_s18  ;;  %v478_v4 = vrot.slane %v1713_v2, 1  ;;  %v304_v7 = vld [vmem:[%s1728_s24] sm:$0xff]  ;;  %v305_v8 = vld [vmem:[%s1728_s24 + $0x8] sm:$0xff]  ;;  %v306_v9 = vld [vmem:[%s1728_s24 + $0x10] sm:$0xff]  ;;  %vm735_vm11 = vcmask 293888   ;;  %vm940_vm12 = vcmask 1045504  }
  0x18   : > { %v324_v10 = vmul.f32 %v1721_v3, %v304_v7  ;;  %v325_v11 = vmul.f32 %v1721_v3, %v305_v8  ;;  %v326_v12 = vmul.f32 %v1721_v3, %v306_v9  ;;  %v308_v23 = vld [vmem:[%s1728_s24 + $0x20] sm:$0xff]  ;;  %v307_v26 = vld [vmem:[%s1728_s24 + $0x18] sm:$0xff]  ;;  %v309_v45 = vld [vmem:[%s1728_s24 + $0x28] sm:$0xff]  ;;  %vm1173_vm13 = vcmask 326656  }
  0x19   : > { %v480_v13 = vsel %vm477_vm1, %v478_v4, %v479_v5  ;;  %v328_v30 = vmul.f32 %v1721_v3, %v308_v23  ;;  %v327_v31 = vmul.f32 %v1721_v3, %v307_v26  ;;  %v310_v46 = vld [vmem:[%s1728_s24 + $0x30] sm:$0xff]  ;;  %v329_v50 = vmul.f32 %v1721_v3, %v309_v45  ;;  %v311_v63 = vld [vmem:[%s1728_s24 + $0x38] sm:$0xff]  ;;  %v312_v0 = vld [vmem:[%s1728_s24 + $0x40] sm:$0xff] }
  0x1a   : > { %v344_v14 = vadd.f32 %v1733_v6, %v324_v10  ;;  %v345_v15 = vadd.f32 %v1733_v6, %v325_v11  ;;  %v346_v16 = vadd.f32 %v1733_v6, %v326_v12  ;;  %v330_v48 = vmul.f32 %v1721_v3, %v310_v46  ;;  %v314_v23 = vld [vmem:[%s1728_s24 + $0x50] sm:$0xff] }
  0x1b   : > { %v348_v35 = vadd.f32 %v1733_v6, %v328_v30  ;;  %v347_v36 = vadd.f32 %v1733_v6, %v327_v31  ;;  %v349_v56 = vadd.f32 %v1733_v6, %v329_v50  ;;  %v332_v7 = vmul.f32 %v1721_v3, %v312_v0 }
  0x1c   : > { %v360_v17 = vmax.f32 %v344_v14, 0.0  ;;  %v361_v18 = vmax.f32 %v345_v15, 0.0  ;;  %v362_v19 = vmax.f32 %v346_v16, 0.0  ;;  %v350_v55 = vadd.f32 %v1733_v6, %v330_v48 }
  0x1d   : > { %v364_v40 = vmax.f32 %v348_v35, 0.0  ;;  %v363_v41 = vmax.f32 %v347_v36, 0.0  ;;  %v365_v60 = vmax.f32 %v349_v56, 0.0  ;;  %v331_v9 = vmul.f32 %v1721_v3, %v311_v63  ;;  %v733_v63 = vld [vmem:[%s2357_s3 + $0x18] sm:$0xff] }
  0x1e   : > { %v394_v20 = vrot.slane %v360_v17, 7  ;;  %v395_v21 = vrot.slane %v361_v18, 7  ;;  %v396_v22 = vrot.slane %v362_v19, 7  ;;  %v366_v59 = vmax.f32 %v350_v55, 0.0  ;;  %v316_v55 = vld [vmem:[%s1728_s24 + $0x60] sm:$0xff] }
  0x1f   : > { %502 = vrot.lane.b32.xlu0 %v480_v13, %s1603_s10  ;;  %v398_v43 = vrot.slane %v364_v40, 7  ;;  %v397_v44 = vrot.slane %v363_v41, 7  ;;  %v399_v62 = vrot.slane %v365_v60, 7  ;;  %v352_v14 = vadd.f32 %v1733_v6, %v332_v7 }
  0x20   : > { %v429_v24 = vsel %vm427_vm0, 0.0, %v394_v20  ;;  %v430_v25 = vsel %vm427_vm0, 0.0, %v395_v21  ;;  %v559_v27 = vrot.slane %v394_v20, 1  ;;  %v431_v29 = vsel %vm427_vm0, 0.0, %v396_v22 }
  0x21   : > { %534 = vrot.lane.b32.xlu1 %v429_v24, %s1604_s12  ;;  %607 = vrot.lane.b32.xlu2 %v430_v25, %s1605_s13  ;;  %v558_v28 = vrot.slane %v429_v24, 1  ;;  %v561_v32 = vrot.slane %v431_v29, 1  ;;  %v562_v33 = vrot.slane %v396_v22, 1  ;;  %v482_v38 = vrot.slane %v395_v21, 1  ;;  %v313_v22 = vld [vmem:[%s1728_s24 + $0x48] sm:$0xff] }
  0x22   : > { %v481_v39 = vrot.slane %v430_v25, 1  ;;  %v433_v47 = vsel %vm427_vm0, 0.0, %v398_v43  ;;  %v432_v49 = vsel %vm427_vm0, 0.0, %v397_v44  ;;  %v485_v52 = vrot.slane %v397_v44, 1 }
  0x23   : > { %v1759_v34 = vsel %vm477_vm1, %v558_v28, %v559_v27  ;;  %v1766_v37 = vsel %vm477_vm1, %v561_v32, %v562_v33  ;;  %v484_v51 = vrot.slane %v432_v49, 1  ;;  %v564_v53 = vrot.slane %v433_v47, 1 }
  0x24   : > { %v483_v42 = vsel %vm477_vm1, %v481_v39, %v482_v38  ;;  %v565_v54 = vrot.slane %v398_v43, 1  ;;  %v400_v61 = vrot.slane %v366_v59, 7  ;;  %v434_v8 = vsel %vm427_vm0, 0.0, %v399_v62 }
  0x25   : > { %v486_v57 = vsel %vm477_vm1, %v484_v51, %v485_v52  ;;  %v487_v10 = vrot.slane %v434_v8, 1  ;;  %v488_v11 = vrot.slane %v399_v62, 1  ;;  %v351_v15 = vadd.f32 %v1733_v6, %v331_v9  ;;  %v734_v62 = vld [vmem:[%s2357_s3 + $0x20] sm:$0xf] }
  0x26   : > { %v1786_v58 = vsel %vm477_vm1, %v564_v53, %v565_v54  ;;  %v435_v5 = vsel %vm427_vm0, 0.0, %v400_v61  ;;  %v568_v13 = vrot.slane %v400_v61, 1  ;;  %v368_v18 = vmax.f32 %v352_v14, 0.0  ;;  %1438 = vmatpush.msk.msra.mxu0 %vm760_vm2, %v734_v62  ;;  %v732_v14 = vld [vmem:[%s2357_s3 + $0x10] sm:$0xff] }
  0x27   : > { %455 = vrot.lane.b32.xlu0 %v430_v25, %s1602_s18  ;;  %v567_v12 = vrot.slane %v435_v5, 1  ;;  %v489_v16 = vsel %vm477_vm1, %v487_v10, %v488_v11  ;;  %v367_v19 = vmax.f32 %v351_v15, 0.0  ;;  %v334_v25 = vmul.f32 %v1721_v3, %v314_v23 }
  0x28   : > { %v402_v20 = vrot.slane %v368_v18, 7  ;;  %v333_v27 = vmul.f32 %v1721_v3, %v313_v22  ;;  %v336_v56 = vmul.f32 %v1721_v3, %v316_v55  ;;  %776 = vmatpush.msra.mxu0 %v733_v63  ;;  %v731_v18 = vld [vmem:[%s2357_s3 + $0x8] sm:$0xff]  ;;  %vm1182_vm14 = vcmask 392192  }
  0x29   : > { %582 = vrot.lane.b32.xlu1 %v1759_v34, %s1606_s17  ;;  %536 = vrot.lane.b32.xlu2 %v431_v29, %s1604_s12  ;;  %v1805_v17 = vsel %vm477_vm1, %v567_v12, %v568_v13  ;;  %v401_v21 = vrot.slane %v367_v19, 7  ;;  %v354_v32 = vadd.f32 %v1733_v6, %v334_v25  ;;  %v318_v25 = vld [vmem:[%s1728_s24 + $0x70] sm:$0xff]  ;;  %vm1191_vm15 = vcmask 457728  }
  0x2a   : > { %v437_v24 = vsel %vm427_vm0, 0.0, %v402_v20  ;;  %v571_v31 = vrot.slane %v402_v20, 1  ;;  %v353_v33 = vadd.f32 %v1733_v6, %v333_v27  ;;  %777 = vmatpush.msra.mxu0 %v732_v14 }
  0x2b   : > { %v436_v26 = vsel %vm427_vm0, 0.0, %v401_v21  ;;  %v491_v29 = vrot.slane %v401_v21, 1  ;;  %v570_v30 = vrot.slane %v437_v24, 1  ;;  %v370_v38 = vmax.f32 %v354_v32, 0.0  ;;  %v730_v21 = vld [vmem:[%s2357_s3] sm:$0xff]  ;;  %v319_v32 = vld [vmem:[%s1728_s24 + $0x78] sm:$0xff] }
  0x2c   : > { %v490_v28 = vrot.slane %v436_v26, 1  ;;  %v369_v39 = vmax.f32 %v353_v33, 0.0  ;;  %778 = vmatpush.msra.mxu0 %v731_v18  ;;  %v339_v33 = vmul.f32 %v1721_v3, %v319_v32 }
  0x2d   : > { %v1824_v36 = vsel %vm477_vm1, %v570_v30, %v571_v31  ;;  %v404_v40 = vrot.slane %v370_v38, 7 }
  0x2e   : > { %v492_v35 = vsel %vm477_vm1, %v490_v28, %v491_v29  ;;  %v403_v41 = vrot.slane %v369_v39, 7  ;;  %779 = vmatpush.msra.mxu0 %v730_v21  ;;  %v359_v38 = vadd.f32 %v1733_v6, %v339_v33 }
  0x2f   : > { %584 = vrot.lane.b32.xlu0 %v1766_v37, %s1606_s17  ;;  %v439_v43 = vsel %vm427_vm0, 0.0, %v404_v40 }
  0x30   : > { %v438_v44 = vsel %vm427_vm0, 0.0, %v403_v41  ;;  %v573_v48 = vrot.slane %v439_v43, 1 }
  0x31   : > { %504 = vrot.lane.b32.xlu1 %v483_v42, %s1603_s10  ;;  %634 = vrot.lane.b32.xlu2 %v483_v42, %s1607_s19  ;;  %v315_v42 = vld [vmem:[%s1728_s24 + $0x58] sm:$0xff]  ;;  %v493_v46 = vrot.slane %v438_v44, 1 }
  0x32   : > { %v335_v45 = vmul.f32 %v1721_v3, %v315_v42 }
  0x34   : > { %v355_v50 = vadd.f32 %v1733_v6, %v335_v45 }
  0x36   : > { %v371_v53 = vmax.f32 %v355_v50, 0.0 }
  0x37   : > { %457 = vrot.lane.b32.xlu0 %v432_v49, %s1602_s18 }
  0x38   : > { %v405_v54 = vrot.slane %v371_v53, 7 }
  0x39   : > { %609 = vrot.lane.b32.xlu1 %v432_v49, %s1605_s13  ;;  %636 = vrot.lane.b32.xlu2 %v486_v57, %s1607_s19  ;;  %v574_v49 = vrot.slane %v404_v40, 1 }
  0x3a   : > { %v440_v59 = vsel %vm427_vm0, 0.0, %v405_v54  ;;  %v497_v61 = vrot.slane %v405_v54, 1 }
  0x3b   : > { %v1840_v52 = vsel %vm477_vm1, %v573_v48, %v574_v49  ;;  %v496_v60 = vrot.slane %v440_v59, 1 }
  0x3d   : > { %v498_v9 = vsel %vm477_vm1, %v496_v60, %v497_v61 }
  0x3f   : > { %586 = vrot.lane.b32.xlu0 %v1786_v58, %s1606_s17 }
  0x41   : > { %506 = vrot.lane.b32.xlu1 %v486_v57, %s1603_s10  ;;  %538 = vrot.lane.b32.xlu2 %v433_v47, %s1604_s12  ;;  %v494_v47 = vrot.slane %v403_v41, 1  ;;  %v356_v57 = vadd.f32 %v1733_v6, %v336_v56 }
  0x43   : > { %v495_v51 = vsel %vm477_vm1, %v493_v46, %v494_v47  ;;  %v372_v0 = vmax.f32 %v356_v57, 0.0 }
  0x47   : > { %459 = vrot.lane.b32.xlu0 %v434_v8, %s1602_s18 }
  0x49   : > { %611 = vrot.lane.b32.xlu1 %v434_v8, %s1605_s13  ;;  %638 = vrot.lane.b32.xlu2 %v489_v16, %s1607_s19  ;;  %v406_v8 = vrot.slane %v372_v0, 7 }
  0x4b   : > { %v441_v11 = vsel %vm427_vm0, 0.0, %v406_v8  ;;  %v577_v12 = vrot.slane %v406_v8, 1 }
  0x4c   : > { %v576_v13 = vrot.slane %v441_v11, 1 }
  0x4f   : > { %588 = vrot.lane.b32.xlu0 %v1805_v17, %s1606_s17 }
  0x51   : > { %508 = vrot.lane.b32.xlu1 %v489_v16, %s1603_s10  ;;  %540 = vrot.lane.b32.xlu2 %v435_v5, %s1604_s12  ;;  %v317_v5 = vld [vmem:[%s1728_s24 + $0x68] sm:$0xff]  ;;  %v1870_v16 = vsel %vm477_vm1, %v576_v13, %v577_v12 }
  0x52   : > { %v337_v7 = vmul.f32 %v1721_v3, %v317_v5 }
  0x54   : > { %v357_v10 = vadd.f32 %v1733_v6, %v337_v7 }
  0x56   : > { %v373_v15 = vmax.f32 %v357_v10, 0.0 }
  0x57   : > { %461 = vrot.lane.b32.xlu0 %v436_v26, %s1602_s18 }
  0x58   : > { %v407_v20 = vrot.slane %v373_v15, 7 }
  0x59   : > { %613 = vrot.lane.b32.xlu1 %v436_v26, %s1605_s13  ;;  %640 = vrot.lane.b32.xlu2 %v492_v35, %s1607_s19  ;;  %v338_v26 = vmul.f32 %v1721_v3, %v318_v25 }
  0x5a   : > { %v442_v22 = vsel %vm427_vm0, 0.0, %v407_v20 }
  0x5b   : > { %v499_v23 = vrot.slane %v442_v22, 1  ;;  %v358_v28 = vadd.f32 %v1733_v6, %v338_v26 }
  0x5d   : > { %v374_v31 = vmax.f32 %v358_v28, 0.0 }
  0x5f   : > { %590 = vrot.lane.b32.xlu0 %v1824_v36, %s1606_s17 }
  0x61   : > { %510 = vrot.lane.b32.xlu1 %v492_v35, %s1603_s10  ;;  %542 = vrot.lane.b32.xlu2 %v437_v24, %s1604_s12  ;;  %v500_v24 = vrot.slane %v407_v20, 1  ;;  %v408_v35 = vrot.slane %v374_v31, 7 }
  0x63   : > { %v501_v30 = vsel %vm477_vm1, %v499_v23, %v500_v24  ;;  %v443_v39 = vsel %vm427_vm0, 0.0, %v408_v35  ;;  %v580_v42 = vrot.slane %v408_v35, 1 }
  0x64   : > { %v579_v41 = vrot.slane %v443_v39, 1 }
  0x67   : > { %463 = vrot.lane.b32.xlu0 %v438_v44, %s1602_s18 }
  0x69   : > { %615 = vrot.lane.b32.xlu1 %v438_v44, %s1605_s13  ;;  %642 = vrot.lane.b32.xlu2 %v495_v51, %s1607_s19  ;;  %v1895_v44 = vsel %vm477_vm1, %v579_v41, %v580_v42 }
  0x6f   : > { %592 = vrot.lane.b32.xlu0 %v1840_v52, %s1606_s17 }
  0x71   : > { %512 = vrot.lane.b32.xlu1 %v495_v51, %s1603_s10  ;;  %544 = vrot.lane.b32.xlu2 %v439_v43, %s1604_s12  ;;  %v375_v43 = vmax.f32 %v359_v38, 0.0 }
  0x73   : > { %v409_v3 = vrot.slane %v375_v43, 7 }
  0x75   : > { %v444_v48 = vsel %vm427_vm0, 0.0, %v409_v3  ;;  %v632_v62 = vrot.slane %v409_v3, 1 }
  0x76   : > { %v631_v61 = vrot.slane %v444_v48, 1 }
  0x77   : > { %465 = vrot.lane.b32.xlu0 %v440_v59, %s1602_s18 }
  0x78   : > { %v633_v8 = vsel %vm477_vm1, %v631_v61, %v632_v62  ;;  %v941_v61 = vrot.slane %v1713_v2, 2 }
  0x79   : > { %617 = vrot.lane.b32.xlu1 %v440_v59, %s1605_s13  ;;  %644 = vrot.lane.b32.xlu2 %v498_v9, %s1607_s19 }
  0x7b   : > { %v608_v19 = vpop.permute.xlu2 %607 }
  0x7f   : > { %594 = vrot.lane.b32.xlu0 %v1870_v16, %s1606_s17 }
  0x81   : > { %514 = vrot.lane.b32.xlu1 %v498_v9, %s1603_s10  ;;  %546 = vrot.lane.b32.xlu2 %v441_v11, %s1604_s12 }
  0x83   : > { %v537_v29 = vpop.permute.xlu2 %536 }
  0x87   : > { %467 = vrot.lane.b32.xlu0 %v442_v22, %s1602_s18  ;;  %s1608_s18 = smov 48  }
  0x89   : > { %v454_v27 = vpop.permute.xlu0 %453  ;;  %619 = vrot.lane.b32.xlu1 %v442_v22, %s1605_s13  ;;  %646 = vrot.lane.b32.xlu2 %v501_v30, %s1607_s19 }
  0x8b   : > { %v635_v45 = vpop.permute.xlu2 %634 }
  0x8f   : > { %596 = vrot.lane.b32.xlu0 %v1895_v44, %s1606_s17 }
  0x91   : > { %v503_v40 = vpop.permute.xlu0 %502  ;;  %516 = vrot.lane.b32.xlu1 %v501_v30, %s1603_s10  ;;  %548 = vrot.lane.b32.xlu2 %v443_v39, %s1604_s12 }
  0x92   : > { %v659_v46 = vsel %vm658_vm3, %v454_v27, %v503_v40 }
  0x93   : > { %v535_v6 = vpop.permute.xlu1 %534  ;;  %v668_v49 = vsel %vm667_vm4, %v659_v46, %v503_v40  ;;  %v637_v50 = vpop.permute.xlu2 %636 }
  0x94   : > { %v677_v51 = vsel %vm676_vm5, %v668_v49, %v535_v6 }
  0x99   : > { %v456_v47 = vpop.permute.xlu0 %455  ;;  %621 = vrot.lane.b32.xlu1 %v444_v48, %s1605_s13  ;;  %648 = vrot.lane.b32.xlu2 %v633_v8, %s1607_s19 }
  0x9b   : > { %v583_v53 = vpop.permute.xlu1 %582  ;;  %v539_v5 = vpop.permute.xlu2 %538 }
  0x9c   : > { %v686_v54 = vsel %vm685_vm6, %v677_v51, %v583_v53 }
  0x9d   : > { %v695_v55 = vsel %vm694_vm7, %v686_v54, %v583_v53 }
  0x9e   : > { %v704_v56 = vsel %vm703_vm8, %v695_v55, %v608_v19 }
  0x9f   : > { %v713_v59 = vsel %vm712_vm9, %v704_v56, %v635_v45 }
  0xa0   : > { %v722_v60 = vsel %vm721_vm10, %v713_v59, %v635_v45 }
  0xa1   : > { %v585_v57 = vpop.permute.xlu0 %584  ;;  %1439 = vmatmul.msk.f32.vlgmr.msra.gmra.mxu0 %vm735_vm11, %v722_v60  ;;  %1083 = vrot.lane.b32.xlu2 %v1713_v2, %s1608_s18 }
  0xa3   : > { %v505_v63 = vpop.permute.xlu1 %504  ;;  %v639_v20 = vpop.permute.xlu2 %638 }
  0xa4   : > { %v660_v0 = vsel %vm658_vm3, %v456_v47, %v505_v63 }
  0xa5   : > { %v669_v7 = vsel %vm667_vm4, %v660_v0, %v505_v63 }
  0xa6   : > { %v678_v9 = vsel %vm676_vm5, %v669_v7, %v537_v29 }
  0xa7   : > { %v687_v11 = vsel %vm685_vm6, %v678_v9, %v585_v57 }
  0xa8   : > { %v696_v12 = vsel %vm694_vm7, %v687_v11, %v585_v57  ;;  %v869_v57 = vsel %vm427_vm0, %v1708_v1, 0.0 }
  0xa9   : > { %v458_v10 = vpop.permute.xlu0 %457  ;;  %v893_v60 = vrot.slane %v869_v57, 1  ;;  %v942_v62 = vrot.slane %v869_v57, 2 }
  0xab   : > { %v610_v13 = vpop.permute.xlu1 %609  ;;  %v541_v26 = vpop.permute.xlu2 %540  ;;  %v1954_v0 = vsel %vm477_vm1, %v478_v4, %v893_v60 }
  0xac   : > { %v705_v14 = vsel %vm703_vm8, %v696_v12, %v610_v13  ;;  %916 = vrot.lane.b32.xlu0 %v1954_v0, %s1604_s12 }
  0xad   : > { %v714_v15 = vsel %vm712_vm9, %v705_v14, %v637_v50 }
  0xae   : > { %v723_v18 = vsel %vm721_vm10, %v714_v15, %v637_v50 }
  0xaf   : > { %1440 = vmatmul.msk.f32.gmra.mxu0 %vm735_vm11, %v723_v18 }
  0xb1   : > { %v587_v19 = vpop.permute.xlu0 %586 }
  0xb3   : > { %v507_v21 = vpop.permute.xlu1 %506  ;;  %v641_v35 = vpop.permute.xlu2 %640 }
  0xb4   : > { %v661_v22 = vsel %vm658_vm3, %v458_v10, %v507_v21 }
  0xb5   : > { %v670_v23 = vsel %vm667_vm4, %v661_v22, %v507_v21 }
  0xb6   : > { %v679_v24 = vsel %vm676_vm5, %v670_v23, %v539_v5  ;;  %v1959_v5 = vsel %vm940_vm12, %v941_v61, %v942_v62 }
  0xb7   : > { %v688_v27 = vsel %vm685_vm6, %v679_v24, %v587_v19  ;;  %965 = vrot.lane.b32.xlu1 %v1959_v5, %s1606_s17 }
  0xb8   : > { %v697_v28 = vsel %vm694_vm7, %v688_v27, %v587_v19 }
  0xb9   : > { %v460_v25 = vpop.permute.xlu0 %459 }
  0xbb   : > { %v612_v29 = vpop.permute.xlu1 %611  ;;  %v543_v3 = vpop.permute.xlu2 %542 }
  0xbc   : > { %v706_v30 = vsel %vm703_vm8, %v697_v28, %v612_v29 }
  0xbd   : > { %v715_v31 = vsel %vm712_vm9, %v706_v30, %v639_v20 }
  0xbe   : > { %v724_v32 = vsel %vm721_vm10, %v715_v31, %v639_v20 }
  0xbf   : > { %1441 = vmatmul.msk.f32.gmra.mxu0 %vm735_vm11, %v724_v32 }
  0xc1   : > { %v589_v33 = vpop.permute.xlu0 %588 }
  0xc3   : > { %v509_v38 = vpop.permute.xlu1 %508  ;;  %v643_v53 = vpop.permute.xlu2 %642 }
  0xc4   : > { %v662_v39 = vsel %vm658_vm3, %v460_v25, %v509_v38 }
  0xc5   : > { %v671_v40 = vsel %vm667_vm4, %v662_v39, %v509_v38 }
  0xc6   : > { %v680_v41 = vsel %vm676_vm5, %v671_v40, %v541_v26 }
  0xc7   : > { %v689_v43 = vsel %vm685_vm6, %v680_v41, %v589_v33 }
  0xc8   : > { %v698_v45 = vsel %vm694_vm7, %v689_v43, %v589_v33 }
  0xc9   : > { %v462_v42 = vpop.permute.xlu0 %461 }
  0xcb   : > { %v614_v6 = vpop.permute.xlu1 %613  ;;  %v545_v8 = vpop.permute.xlu2 %544 }
  0xcc   : > { %v707_v46 = vsel %vm703_vm8, %v698_v45, %v614_v6 }
  0xcd   : > { %v716_v47 = vsel %vm712_vm9, %v707_v46, %v641_v35 }
  0xce   : > { %v725_v48 = vsel %vm721_vm10, %v716_v47, %v641_v35 }
  0xcf   : > { %1442 = vmatmul.msk.f32.gmra.mxu0 %vm735_vm11, %v725_v48 }
  0xd1   : > { %v591_v49 = vpop.permute.xlu0 %590 }
  0xd3   : > { %v511_v50 = vpop.permute.xlu1 %510  ;;  %v645_v15 = vpop.permute.xlu2 %644 }
  0xd4   : > { %v663_v51 = vsel %vm658_vm3, %v462_v42, %v511_v50 }
  0xd5   : > { %v672_v54 = vsel %vm667_vm4, %v663_v51, %v511_v50 }
  0xd6   : > { %v681_v55 = vsel %vm676_vm5, %v672_v54, %v543_v3 }
  0xd7   : > { %v690_v59 = vsel %vm685_vm6, %v681_v55, %v591_v49  ;;  %v1997_v55 = vld [vmem:[%s2358_s4] ss:$0 sm:$0xff] }
  0xd8   : > { %v699_v63 = vsel %vm694_vm7, %v690_v59, %v591_v49 }
  0xd9   : > { %v464_v56 = vpop.permute.xlu0 %463 }
  0xdb   : > { %v616_v1 = vpop.permute.xlu1 %615  ;;  %v547_v25 = vpop.permute.xlu2 %546 }
  0xdc   : > { %v708_v7 = vsel %vm703_vm8, %v699_v63, %v616_v1 }
  0xdd   : > { %v717_v9 = vsel %vm712_vm9, %v708_v7, %v643_v53 }
  0xde   : > { %v726_v10 = vsel %vm721_vm10, %v717_v9, %v643_v53 }
  0xdf   : > { %1443 = vmatmul.msk.f32.gmra.mxu0 %vm735_vm11, %v726_v10 }
  0xe1   : > { %v593_v4 = vpop.permute.xlu0 %592 }
  0xe3   : > { %v513_v11 = vpop.permute.xlu1 %512  ;;  %v647_v32 = vpop.permute.xlu2 %646 }
  0xe4   : > { %v664_v12 = vsel %vm658_vm3, %v464_v56, %v513_v11  ;;  %v2002_v56 = vld [vmem:[%s2359_s5] ss:$0 sm:$0xff] }
  0xe5   : > { %v673_v13 = vsel %vm667_vm4, %v664_v12, %v513_v11 }
  0xe6   : > { %v682_v14 = vsel %vm676_vm5, %v673_v13, %v545_v8 }
  0xe7   : > { %v691_v18 = vsel %vm685_vm6, %v682_v14, %v593_v4 }
  0xe8   : > { %v700_v20 = vsel %vm694_vm7, %v691_v18, %v593_v4 }
  0xe9   : > { %v466_v19 = vpop.permute.xlu0 %465 }
  0xeb   : > { %v618_v21 = vpop.permute.xlu1 %617  ;;  %v549_v42 = vpop.permute.xlu2 %548 }
  0xec   : > { %v709_v22 = vsel %vm703_vm8, %v700_v20, %v618_v21 }
  0xed   : > { %v718_v23 = vsel %vm712_vm9, %v709_v22, %v645_v15 }
  0xee   : > { %v727_v24 = vsel %vm721_vm10, %v718_v23, %v645_v15 }
  0xef   : > { %1444 = vmatmul.msk.f32.gmra.mxu0 %vm735_vm11, %v727_v24 }
  0xf1   : > { %v595_v26 = vpop.permute.xlu0 %594 }
  0xf3   : > { %v515_v27 = vpop.permute.xlu1 %514  ;;  %v649_v49 = vpop.permute.xlu2 %648 }
  0xf4   : > { %v665_v28 = vsel %vm658_vm3, %v466_v19, %v515_v27 }
  0xf5   : > { %v674_v29 = vsel %vm667_vm4, %v665_v28, %v515_v27 }
  0xf6   : > { %v683_v30 = vsel %vm676_vm5, %v674_v29, %v547_v25 }
  0xf7   : > { %v692_v31 = vsel %vm685_vm6, %v683_v30, %v595_v26 }
  0xf8   : > { %v701_v33 = vsel %vm694_vm7, %v692_v31, %v595_v26 }
  0xf9   : > { %v468_v35 = vpop.permute.xlu0 %467 }
  0xfb   : > { %v620_v38 = vpop.permute.xlu1 %619 }
  0xfc   : > { %v710_v39 = vsel %vm703_vm8, %v701_v33, %v620_v38 }
  0xfd   : > { %v719_v40 = vsel %vm712_vm9, %v710_v39, %v647_v32 }
  0xfe   : > { %v728_v41 = vsel %vm721_vm10, %v719_v40, %v647_v32 }
  0xff   : > { %1445 = vmatmul.msk.f32.gmra.mxu0 %vm735_vm11, %v728_v41 }
 0x101   : > { %v597_v3 = vpop.permute.xlu0 %596 }
 0x103   : > { %v517_v43 = vpop.permute.xlu1 %516 }
 0x104   : > { %v666_v45 = vsel %vm658_vm3, %v468_v35, %v517_v43 }
 0x105   : > { %v675_v6 = vsel %vm667_vm4, %v666_v45, %v517_v43 }
 0x106   : > { %v684_v46 = vsel %vm676_vm5, %v675_v6, %v549_v42  ;;  %vm1279_vm5 = vcmask 588800  }
 0x107   : > { %v693_v47 = vsel %vm685_vm6, %v684_v46, %v597_v3 }
 0x108   : > { %v702_v48 = vsel %vm694_vm7, %v693_v47, %v597_v3 }
 0x10b   : > { %v622_v50 = vpop.permute.xlu1 %621 }
 0x10c   : > { %v711_v51 = vsel %vm703_vm8, %v702_v48, %v622_v50 }
 0x10d   : > { %v720_v53 = vsel %vm712_vm9, %v711_v51, %v649_v49 }
 0x10e   : > { %v729_v54 = vsel %vm721_vm10, %v720_v53, %v649_v49 }
 0x10f   : > { %1446 = vmatmul.msk.f32.gmra.mxu0 %vm735_vm11, %v729_v54 }
 0x11e   : > { %v781_v57 = vpop.f32.mrf.mxu0 }
 0x11f   : > { %v809_v59 = vmul.f32 %v1997_v55, %v781_v57 }
 0x121   : > { %v821_v60 = vadd.f32 %v2002_v56, %v809_v59 }
 0x123   : > { %v829_v61 = vmax.f32 %v821_v60, 0.0 }
 0x125   : > { %v845_v62 = vrot.slane %v829_v61, 7 }
 0x127   : > { %v870_v63 = vsel %vm427_vm0, %v845_v62, 0.0  ;;  %v2008_v1 = vsel %vm427_vm0, 0.0, %v845_v62 }
 0x128   : > { %990 = vrot.lane.b32.xlu2 %v2008_v1, %s1609_s25  ;;  %v944_v7 = vrot.slane %v2008_v1, 2  ;;  %v945_v8 = vrot.slane %v870_v63, 2  ;;  %v895_v9 = vrot.slane %v2008_v1, 1  ;;  %v896_v10 = vrot.slane %v870_v63, 1 }
 0x12a   : > { %v946_v4 = vsel %vm940_vm12, %v944_v7, %v945_v8  ;;  %v897_v11 = vsel %vm477_vm1, %v895_v9, %v896_v10 }
 0x12b   : > { %1045 = vrot.lane.b32.xlu1 %v946_v4, %s1610_s26  ;;  %1018 = vrot.lane.b32.xlu0 %v897_v11, %s1611_s20 }
 0x12c   : > { %v784_v12 = vpop.f32.mrf.mxu0 }
 0x12d   : > { %v810_v13 = vmul.f32 %v1997_v55, %v784_v12 }
 0x12f   : > { %v822_v14 = vadd.f32 %v2002_v56, %v810_v13 }
 0x130   : > { %918 = vrot.lane.b32.xlu2 %v897_v11, %s1604_s12  ;;  %v2091_v11 = vpop.permute.xlu2 %1083 }
 0x131   : > { %v830_v15 = vmax.f32 %v822_v14, 0.0 }
 0x133   : > { %v846_v18 = vrot.slane %v830_v15, 7  ;;  %967 = vrot.lane.b32.xlu0 %v946_v4, %s1606_s17 }
 0x135   : > { %v2023_v19 = vsel %vm427_vm0, 0.0, %v846_v18  ;;  %v871_v20 = vsel %vm427_vm0, %v846_v18, 0.0 }
 0x136   : > { %992 = vrot.lane.b32.xlu1 %v2023_v19, %s1609_s25  ;;  %v898_v21 = vrot.slane %v2023_v19, 1  ;;  %v899_v22 = vrot.slane %v871_v20, 1  ;;  %v947_v23 = vrot.slane %v2023_v19, 2  ;;  %v948_v24 = vrot.slane %v871_v20, 2 }
 0x138   : > { %1069 = vrot.lane.b32.xlu2 %v2023_v19, %s1608_s18  ;;  %v900_v25 = vsel %vm477_vm1, %v898_v21, %v899_v22  ;;  %v949_v28 = vsel %vm940_vm12, %v947_v23, %v948_v24  ;;  %v1217_v22 = vld [vmem:[%s2360_s6 + $0x40] sm:$0xff]  ;;  %v1216_v24 = vld [vmem:[%s2360_s6 + $0x38] sm:$0xff] }
 0x139   : > { %1311 = vmatpush.msra.mxu2 %v1217_v22  ;;  %1471 = vmatpush.msra.mxu3 %v1217_v22 }
 0x13b   : > { %1093 = vrot.lane.b32.xlu0 %v900_v25, %s2363_s21  ;;  %1312 = vmatpush.msra.mxu2 %v1216_v24 }
 0x13c   : > { %v787_v26 = vpop.f32.mrf.mxu0  ;;  %1472 = vmatpush.msra.mxu3 %v1216_v24 }
 0x13d   : > { %v811_v27 = vmul.f32 %v1997_v55, %v787_v26 }
 0x13e   : > { %1117 = vrot.lane.b32.xlu1 %v949_v28, %s1613_s22 }
 0x13f   : > { %v823_v29 = vadd.f32 %v2002_v56, %v811_v27  ;;  %v1214_v27 = vld [vmem:[%s2360_s6 + $0x28] sm:$0xff] }
 0x140   : > { %1020 = vrot.lane.b32.xlu2 %v900_v25, %s1611_s20 }
 0x141   : > { %v831_v30 = vmax.f32 %v823_v29, 0.0 }
 0x143   : > { %1047 = vrot.lane.b32.xlu0 %v949_v28, %s1610_s26  ;;  %v847_v31 = vrot.slane %v831_v30, 7 }
 0x145   : > { %v2042_v32 = vsel %vm427_vm0, 0.0, %v847_v31  ;;  %v872_v33 = vsel %vm427_vm0, %v847_v31, 0.0  ;;  %v1213_v31 = vld [vmem:[%s2360_s6 + $0x20] sm:$0xff] }
 0x146   : > { %920 = vrot.lane.b32.xlu1 %v900_v25, %s1604_s12  ;;  %v901_v35 = vrot.slane %v2042_v32, 1  ;;  %v902_v38 = vrot.slane %v872_v33, 1  ;;  %v950_v40 = vrot.slane %v2042_v32, 2  ;;  %v951_v41 = vrot.slane %v872_v33, 2  ;;  %v1215_v25 = vld [vmem:[%s2360_s6 + $0x30] sm:$0xff] }
 0x147   : > { %1313 = vmatpush.msra.mxu2 %v1215_v25  ;;  %1473 = vmatpush.msra.mxu3 %v1215_v25 }
 0x148   : > { %969 = vrot.lane.b32.xlu2 %v949_v28, %s1606_s17  ;;  %v903_v43 = vsel %vm477_vm1, %v901_v35, %v902_v38  ;;  %v952_v45 = vsel %vm940_vm12, %v950_v40, %v951_v41  ;;  %v1212_v35 = vld [vmem:[%s2360_s6 + $0x18] sm:$0xff]  ;;  %v1211_v41 = vld [vmem:[%s2360_s6 + $0x10] sm:$0xff] }
 0x149   : > { %1314 = vmatpush.msra.mxu2 %v1214_v27  ;;  %1474 = vmatpush.msra.mxu3 %v1214_v27 }
 0x14b   : > { %994 = vrot.lane.b32.xlu0 %v2042_v32, %s1609_s25  ;;  %1315 = vmatpush.msra.mxu2 %v1213_v31 }
 0x14c   : > { %v790_v39 = vpop.f32.mrf.mxu0  ;;  %1475 = vmatpush.msra.mxu3 %v1213_v31 }
 0x14d   : > { %v812_v42 = vmul.f32 %v1997_v55, %v790_v39  ;;  %1316 = vmatpush.msra.mxu2 %v1212_v35 }
 0x14e   : > { %1071 = vrot.lane.b32.xlu1 %v2042_v32, %s1608_s18  ;;  %1476 = vmatpush.msra.mxu3 %v1212_v35 }
 0x14f   : > { %v824_v3 = vadd.f32 %v2002_v56, %v812_v42  ;;  %1317 = vmatpush.msra.mxu2 %v1211_v41 }
 0x150   : > { %1095 = vrot.lane.b32.xlu2 %v903_v43, %s2363_s21  ;;  %1477 = vmatpush.msra.mxu3 %v1211_v41 }
 0x151   : > { %v832_v6 = vmax.f32 %v824_v3, 0.0 }
 0x153   : > { %1119 = vrot.lane.b32.xlu0 %v952_v45, %s1613_s22  ;;  %v848_v46 = vrot.slane %v832_v6, 7 }
 0x155   : > { %v2062_v47 = vsel %vm427_vm0, 0.0, %v848_v46  ;;  %v873_v48 = vsel %vm427_vm0, %v848_v46, 0.0  ;;  %v1209_v46 = vld [vmem:[%s2360_s6] sm:$0xff] }
 0x156   : > { %1022 = vrot.lane.b32.xlu1 %v903_v43, %s1611_s20  ;;  %v904_v50 = vrot.slane %v2062_v47, 1  ;;  %v905_v51 = vrot.slane %v873_v48, 1  ;;  %v953_v54 = vrot.slane %v2062_v47, 2  ;;  %v954_v57 = vrot.slane %v873_v48, 2 }
 0x158   : > { %1049 = vrot.lane.b32.xlu2 %v952_v45, %s1610_s26  ;;  %v906_v59 = vsel %vm477_vm1, %v904_v50, %v905_v51  ;;  %v955_v61 = vsel %vm940_vm12, %v953_v54, %v954_v57  ;;  %v917_v51 = vpop.permute.xlu0 %916  ;;  %v966_v57 = vpop.permute.xlu1 %965 }
 0x15b   : > { %922 = vrot.lane.b32.xlu0 %v903_v43, %s1604_s12 }
 0x15c   : > { %v793_v49 = vpop.f32.mrf.mxu0 }
 0x15d   : > { %v813_v53 = vmul.f32 %v1997_v55, %v793_v49 }
 0x15e   : > { %971 = vrot.lane.b32.xlu1 %v952_v45, %s1606_s17  ;;  %v1210_v45 = vld [vmem:[%s2360_s6 + $0x8] sm:$0xff] }
 0x15f   : > { %v825_v60 = vadd.f32 %v2002_v56, %v813_v53  ;;  %1318 = vmatpush.msra.mxu2 %v1210_v45  ;;  %1478 = vmatpush.msra.mxu3 %v1210_v45  ;;  %v1218_v53 = vld [vmem:[%s2361_s7] sm:$0xf] }
 0x160   : > { %996 = vrot.lane.b32.xlu2 %v2062_v47, %s1609_s25  ;;  %1447 = vmatpush.msk.msra.mxu1 %vm760_vm2, %v1218_v53  ;;  %vm1200_vm2 = vcmask 523264  }
 0x161   : > { %v833_v62 = vmax.f32 %v825_v60, 0.0  ;;  %1319 = vmatpush.msra.mxu2 %v1209_v46  ;;  %1479 = vmatpush.msra.mxu3 %v1209_v46 }
 0x162   : > { %1448 = vmatmul.msk.f32.vlgmr.msra.gmra.mxu1 %vm658_vm3, %v1759_v34 }
 0x163   : > { %1073 = vrot.lane.b32.xlu0 %v2062_v47, %s1608_s18  ;;  %v849_v63 = vrot.slane %v833_v62, 7 }
 0x165   : > { %v2082_v7 = vsel %vm427_vm0, 0.0, %v849_v63  ;;  %v874_v8 = vsel %vm427_vm0, %v849_v63, 0.0 }
 0x166   : > { %1097 = vrot.lane.b32.xlu1 %v906_v59, %s2363_s21  ;;  %v907_v10 = vrot.slane %v2082_v7, 1  ;;  %v908_v4 = vrot.slane %v874_v8, 1  ;;  %v956_v13 = vrot.slane %v2082_v7, 2  ;;  %v957_v14 = vrot.slane %v874_v8, 2 }
 0x168   : > { %1121 = vrot.lane.b32.xlu2 %v955_v61, %s1613_s22  ;;  %v909_v15 = vsel %vm477_vm1, %v907_v10, %v908_v4  ;;  %v958_v20 = vsel %vm940_vm12, %v956_v13, %v957_v14 }
 0x16a   : > { %1449 = vmatmul.msk.f32.gmra.mxu1 %vm658_vm3, %v1766_v37 }
 0x16b   : > { %1024 = vrot.lane.b32.xlu0 %v906_v59, %s1611_s20 }
 0x16c   : > { %v796_v9 = vpop.f32.mrf.mxu0 }
 0x16d   : > { %v814_v12 = vmul.f32 %v1997_v55, %v796_v9 }
 0x16e   : > { %1051 = vrot.lane.b32.xlu1 %v955_v61, %s1610_s26 }
 0x16f   : > { %v826_v18 = vadd.f32 %v2002_v56, %v814_v12  ;;  %v1141_v12 = vsel %vm667_vm4, %v1713_v2, %v917_v51 }
 0x170   : > { %924 = vrot.lane.b32.xlu2 %v906_v59, %s1604_s12 }
 0x171   : > { %v834_v21 = vmax.f32 %v826_v18, 0.0  ;;  %v1149_v18 = vsel %vm685_vm6, %v1141_v12, %v966_v57 }
 0x172   : > { %1450 = vmatmul.msk.f32.gmra.mxu1 %vm658_vm3, %v1786_v58 }
 0x173   : > { %998 = vrot.lane.b32.xlu0 %v2082_v7, %s1609_s25  ;;  %v850_v26 = vrot.slane %v834_v21, 7 }
 0x175   : > { %v2118_v28 = vsel %vm427_vm0, 0.0, %v850_v26  ;;  %v875_v29 = vsel %vm427_vm0, %v850_v26, 0.0 }
 0x176   : > { %973 = vrot.lane.b32.xlu1 %v955_v61, %s1606_s17  ;;  %v959_v38 = vrot.slane %v2118_v28, 2  ;;  %v960_v39 = vrot.slane %v875_v29, 2  ;;  %v910_v42 = vrot.slane %v2118_v28, 1  ;;  %v911_v43 = vrot.slane %v875_v29, 1 }
 0x178   : > { %1075 = vrot.lane.b32.xlu2 %v2082_v7, %s1608_s18  ;;  %v961_v3 = vsel %vm940_vm12, %v959_v38, %v960_v39  ;;  %v912_v49 = vsel %vm477_vm1, %v910_v42, %v911_v43 }
 0x17a   : > { %1451 = vmatmul.msk.f32.gmra.mxu1 %vm658_vm3, %v1805_v17 }
 0x17b   : > { %1099 = vrot.lane.b32.xlu0 %v909_v15, %s2363_s21  ;;  %s2367_s21 = smov 56  }
 0x17c   : > { %v799_v30 = vpop.f32.mrf.mxu0 }
 0x17d   : > { %v815_v40 = vmul.f32 %v1997_v55, %v799_v30 }
 0x17e   : > { %1123 = vrot.lane.b32.xlu1 %v958_v20, %s1613_s22 }
 0x17f   : > { %v827_v6 = vadd.f32 %v2002_v56, %v815_v40 }
 0x180   : > { %1026 = vrot.lane.b32.xlu2 %v909_v15, %s1611_s20 }
 0x181   : > { %v835_v50 = vmax.f32 %v827_v6, 0.0 }
 0x182   : > { %v2104_v23 = vpop.permute.xlu2 %990  ;;  %1452 = vmatmul.msk.f32.gmra.mxu1 %vm658_vm3, %v1824_v36 }
 0x183   : > { %926 = vrot.lane.b32.xlu0 %v909_v15, %s1604_s12  ;;  %v851_v54 = vrot.slane %v835_v50, 7  ;;  %v1157_v2 = vsel %vm703_vm8, %v1149_v18, %v2104_v23 }
 0x185   : > { %v2162_v61 = vsel %vm427_vm0, 0.0, %v851_v54  ;;  %v876_v62 = vsel %vm427_vm0, %v851_v54, 0.0 }
 0x186   : > { %1053 = vrot.lane.b32.xlu1 %v958_v20, %s1610_s26  ;;  %v913_v9 = vrot.slane %v2162_v61, 1  ;;  %v914_v10 = vrot.slane %v876_v62, 1  ;;  %v962_v14 = vrot.slane %v2162_v61, 2  ;;  %v963_v15 = vrot.slane %v876_v62, 2 }
 0x188   : > { %975 = vrot.lane.b32.xlu2 %v958_v20, %s1606_s17  ;;  %v964_v37 = vsel %vm940_vm12, %v962_v14, %v963_v15 }
 0x18a   : > { %v2125_v33 = vpop.permute.xlu2 %918  ;;  %1453 = vmatmul.msk.f32.gmra.mxu1 %vm658_vm3, %v1840_v52 }
 0x18b   : > { %1077 = vrot.lane.b32.xlu0 %v2118_v28, %s1608_s18  ;;  %v1142_v46 = vsel %vm667_vm4, %v2008_v1, %v2125_v33 }
 0x18c   : > { %v802_v60 = vpop.f32.mrf.mxu0 }
 0x18d   : > { %v816_v8 = vmul.f32 %v1997_v55, %v802_v60  ;;  %v915_v55 = vsel %vm477_vm1, %v913_v9, %v914_v10 }
 0x18e   : > { %1000 = vrot.lane.b32.xlu1 %v2118_v28, %s1609_s25 }
 0x18f   : > { %v828_v4 = vadd.f32 %v2002_v56, %v816_v8 }
 0x190   : > { %977 = vrot.lane.b32.xlu2 %v961_v3, %s1606_s17 }
 0x191   : > { %v836_v21 = vmax.f32 %v828_v4, 0.0 }
 0x192   : > { %v1070_v48 = vpop.permute.xlu2 %1069  ;;  %1454 = vmatmul.msk.f32.gmra.mxu1 %vm658_vm3, %v1870_v16 }
 0x193   : > { %928 = vrot.lane.b32.xlu0 %v912_v49, %s1604_s12  ;;  %v852_v24 = vrot.slane %v836_v21, 7 }
 0x195   : > { %v868_v23 = vsel %vm427_vm0, 0.0, %v852_v24  ;;  %v877_v58 = vsel %vm427_vm0, %v852_v24, 0.0 }
 0x196   : > { %1125 = vrot.lane.b32.xlu1 %v961_v3, %s1613_s22  ;;  %v1042_v39 = vrot.slane %v868_v23, 2  ;;  %v1043_v40 = vrot.slane %v877_v58, 2  ;;  %v1015_v42 = vrot.slane %v868_v23, 1  ;;  %v1016_v43 = vrot.slane %v877_v58, 1 }
 0x198   : > { %1101 = vrot.lane.b32.xlu2 %v912_v49, %s2367_s21  ;;  %v1044_v45 = vsel %vm940_vm12, %v1042_v39, %v1043_v40  ;;  %v1017_v6 = vsel %vm477_vm1, %v1015_v42, %v1016_v43 }
 0x19a   : > { %v2159_v59 = vpop.permute.xlu2 %1020  ;;  %1455 = vmatmul.msk.f32.gmra.mxu1 %vm658_vm3, %v1895_v44 }
 0x19b   : > { %1028 = vrot.lane.b32.xlu0 %v912_v49, %s1611_s20 }
 0x19d   : > { %v1019_v63 = vpop.permute.xlu0 %1018  ;;  %v1046_v34 = vpop.permute.xlu1 %1045 }
 0x19e   : > { %1002 = vrot.lane.b32.xlu1 %v2162_v61, %s1609_s25  ;;  %v1165_v22 = vsel %vm721_vm10, %v1157_v2, %v1019_v63 }
 0x19f   : > { %v1174_v26 = vsel %vm1173_vm13, %v1165_v22, %v1046_v34 }
 0x1a0   : > { %1055 = vrot.lane.b32.xlu2 %v961_v3, %s1610_s26  ;;  %v1183_v29 = vsel %vm1182_vm14, %v1174_v26, %v1070_v48 }
 0x1a2   : > { %v2176_v13 = vpop.permute.xlu2 %969 }
 0x1a3   : > { %1030 = vrot.lane.b32.xlu0 %v915_v55, %s1611_s20 }
 0x1a5   : > { %v968_v20 = vpop.permute.xlu0 %967 }
 0x1a6   : > { %1079 = vrot.lane.b32.xlu1 %v2162_v61, %s1608_s18  ;;  %v1150_v48 = vsel %vm685_vm6, %v1142_v46, %v968_v20 }
 0x1a8   : > { %1057 = vrot.lane.b32.xlu2 %v964_v37, %s1610_s26  ;;  %v993_v56 = vpop.permute.xlu1 %992 }
 0x1a9   : > { %v1158_v49 = vsel %vm703_vm8, %v1150_v48, %v993_v56 }
 0x1aa   : > { %v1096_v25 = vpop.permute.xlu2 %1095  ;;  %v1166_v51 = vsel %vm721_vm10, %v1158_v49, %v2159_v59 }
 0x1ab   : > { %979 = vrot.lane.b32.xlu0 %v964_v37, %s1606_s17  ;;  %s296_s17 = sand.u32 1, %s1591_s28  }
 0x1ac   : > { %s1354_s23 = scalar_lea.sflag [#allocation3], %s296_s17 }
 0x1ad   : > { %v1094_v27 = vpop.permute.xlu0 %1093 }
 0x1ae   : > { %930 = vrot.lane.b32.xlu1 %v915_v55, %s1604_s12  ;;  %v1192_v30 = vsel %vm1191_vm15, %v1183_v29, %v1094_v27 }
 0x1b0   : > { %1004 = vrot.lane.b32.xlu2 %v868_v23, %s1609_s25  ;;  %v1118_v31 = vpop.permute.xlu1 %1117 }
 0x1b1   : > { %v1201_v35 = vsel %vm1200_vm2, %v1192_v30, %v1118_v31 }
 0x1b2   : > { %v1050_v38 = vpop.permute.xlu2 %1049  ;;  %1456 = vmatmul.msk.f32.vlgmr.msra.gmra.mxu2 %vm1279_vm5, %v1201_v35 }
 0x1b3   : > { %1103 = vrot.lane.b32.xlu0 %v915_v55, %s2367_s21 }
 0x1b5   : > { %v1048_v41 = vpop.permute.xlu0 %1047 }
 0x1b6   : > { %1081 = vrot.lane.b32.xlu1 %v868_v23, %s1608_s18  ;;  %v1175_v1 = vsel %vm1173_vm13, %v1166_v51, %v1048_v41  ;;  %s1435_s18 = sshll.u32 %s296_s17, 6 }
 0x1b7   : > { %s2296_s25 = scalar_lea.vmem [#allocation2], %s1435_s18 }
 0x1b8   : > { %1129 = vrot.lane.b32.xlu2 %v1044_v45, %s1613_s22  ;;  %v921_v3 = vpop.permute.xlu1 %920  ;;  %s1366_s13 = sshll.u32 %s2296_s25, 4  ;;  %s1367_s13 = int_to_ptr.vmem [resolvable:$true] %s1366_s13 }
 0x1b9   : > { %v1143_v63 = vsel %vm667_vm4, %v2023_v19, %v921_v3 }
 0x1ba   : > { %v997_v17 = vpop.permute.xlu2 %996 }
 0x1bb   : > { %1105 = vrot.lane.b32.xlu0 %v1017_v6, %s2367_s21 }
 0x1bd   : > { %v995_v50 = vpop.permute.xlu0 %994 }
 0x1be   : > { %1032 = vrot.lane.b32.xlu1 %v1017_v6, %s1611_s20 }
 0x1c0   : > { %1127 = vrot.lane.b32.xlu2 %v964_v37, %s1613_s22  ;;  %v1072_v36 = vpop.permute.xlu1 %1071 }
 0x1c1   : > { %v1184_v33 = vsel %vm1182_vm14, %v1175_v1, %v1072_v36 }
 0x1c2   : > { %v1122_v53 = vpop.permute.xlu2 %1121  ;;  %v1193_v57 = vsel %vm1191_vm15, %v1184_v33, %v1096_v25 }
 0x1c3   : > { %1059 = vrot.lane.b32.xlu0 %v1044_v45, %s1610_s26  ;;  %s1470_s26 = sshll.u32 %s1681_s9, 6 }
 0x1c4   : > { %s1365_s10 = scalar_lea.hbm %s2362_s8, %s1470_s26  ;;  %s1557_s26 = scalar_lea.hbm %s2362_s8, 128 }
 0x1c5   : > { %v1120_v54 = vpop.permute.xlu0 %1119  ;;  %s1368_s19 = sshll.u32 %s1365_s10, 4  ;;  %s1369_s19 = int_to_ptr.hbm [resolvable:$true] %s1368_s19 }
 0x1c6   : > { %1107 = vrot.lane.b32.xlu1 %v1954_v0, %s2367_s21  ;;  %v1202_v59 = vsel %vm1200_vm2, %v1193_v57, %v1120_v54  ;;  %v1151_v0 = vsel %vm685_vm6, %v1143_v63, %v2176_v13  ;;  %s1551_s24 = sshra.s32 %s1369_s19, 4  ;;  %s1552_s24 = int_to_ptr.hbm [resolvable:$true] %s1551_s24 }
 0x1c7   : > { %1457 = vmatmul.msk.f32.gmra.mxu2 %vm1279_vm5, %v1202_v59  ;;  %v1159_v10 = vsel %vm703_vm8, %v1151_v0, %v995_v50  ;;  %s1553_s21 = scalar_lea.hbm %s1552_s24, 64  ;;  %p1558_p0 = scmp.lt.s32.totalorder %s1552_s24, %s2362_s8 }
 0x1c8   : > { %v1023_v60 = vpop.permute.xlu1 %1022  ;;  %p1554_p11 = scmp.ne.s32.totalorder %s1552_s24, %s1553_s21  ;;  %p1559_p1 = scmp.lt.s32.totalorder %s1557_s26, %s1553_s21 }
 0x1c9   : > { %v1167_v16 = vsel %vm721_vm10, %v1159_v10, %v1023_v60 }
 0x1ca   : > { %v925_v52 = vpop.permute.xlu2 %924  ;;  %v1176_v4 = vsel %vm1173_vm13, %v1167_v16, %v1050_v38  ;;  %p1555_p12 = pnand %p1554_p11, %p1698_p5  ;;  %p1560_p2 = por %p1559_p1, %p1558_p0 }
 0x1cb   : > { %1131 = vrot.lane.b32.xlu0 %v1959_v5, %s1613_s22  ;;  %v1145_v31 = vsel %vm667_vm4, %v2062_v47, %v925_v52 }
 0x1cc   : > { %p1556_p13 = pneg %p1555_p12 }
 0x1cd   : > { %v923_v62 = vpop.permute.xlu0 %922 }
 0x1ce   : > { %v1144_v20 = vsel %vm667_vm4, %v2042_v32, %v923_v62  ;;  %p1561_p3 = pnand %p1560_p2, %p1556_p13 }
 0x1d0   : > { %v972_v8 = vpop.permute.xlu1 %971 }
 0x1d1   : > { %v1152_v21 = vsel %vm685_vm6, %v1144_v20, %v972_v8 }
 0x1d2   : > { %v1076_v9 = vpop.permute.xlu2 %1075  ;;  %v1160_v2 = vsel %vm703_vm8, %v1152_v21, %v997_v17 }
 0x1d5   : > { %v1074_v34 = vpop.permute.xlu0 %1073 }
 0x1d6   : > { %v1185_v5 = vsel %vm1182_vm14, %v1176_v4, %v1074_v34 }
 0x1d8   : > { %v1098_v12 = vpop.permute.xlu1 %1097 }
 0x1d9   : > { %v1194_v19 = vsel %vm1191_vm15, %v1185_v5, %v1098_v12 }
 0x1da   : > { %v1027_v55 = vpop.permute.xlu2 %1026  ;;  %v1203_v14 = vsel %vm1200_vm2, %v1194_v19, %v1122_v53 }
 0x1db   : > { %1458 = vmatmul.msk.f32.gmra.mxu2 %vm1279_vm5, %v1203_v14 }
 0x1dd   : > { %v1025_v44 = vpop.permute.xlu0 %1024 }
 0x1de   : > { %v1168_v22 = vsel %vm721_vm10, %v1160_v2, %v1025_v44 }
 0x1e0   : > { %v1052_v13 = vpop.permute.xlu1 %1051 }
 0x1e1   : > { %v1177_v24 = vsel %vm1173_vm13, %v1168_v22, %v1052_v13 }
 0x1e2   : > { %v976_v15 = vpop.permute.xlu2 %975  ;;  %v1186_v26 = vsel %vm1182_vm14, %v1177_v24, %v1076_v9 }
 0x1e5   : > { %v999_v18 = vpop.permute.xlu0 %998 }
 0x1e8   : > { %v974_v37 = vpop.permute.xlu1 %973 }
 0x1e9   : > { %v1153_v35 = vsel %vm685_vm6, %v1145_v31, %v974_v37 }
 0x1ea   : > { %v978_v56 = vpop.permute.xlu2 %977  ;;  %v1161_v40 = vsel %vm703_vm8, %v1153_v35, %v999_v18 }
 0x1eb   : > { %v1169_v42 = vsel %vm721_vm10, %v1161_v40, %v1027_v55 }
 0x1ed   : > { %v1100_v25 = vpop.permute.xlu0 %1099 }
 0x1ee   : > { %v1195_v27 = vsel %vm1191_vm15, %v1186_v26, %v1100_v25 }
 0x1f0   : > { %v1124_v23 = vpop.permute.xlu1 %1123 }
 0x1f1   : > { %v1204_v29 = vsel %vm1200_vm2, %v1195_v27, %v1124_v23 }
 0x1f2   : > { %1459 = vmatmul.msk.f32.gmra.mxu2 %vm1279_vm5, %v1204_v29  ;;  %v1102_v32 = vpop.permute.xlu2 %1101 }
 0x1f5   : > { %v927_v58 = vpop.permute.xlu0 %926 }
 0x1f6   : > { %v1146_v1 = vsel %vm667_vm4, %v2082_v7, %v927_v58 }
 0x1f7   : > { %v1154_v54 = vsel %vm685_vm6, %v1146_v1, %v976_v15  ;;  %v1255_v15 = vpop.f32.mrf.mxu1 }
 0x1f8   : > { %v1054_v30 = vpop.permute.xlu1 %1053 }
 0x1f9   : > { %v1178_v43 = vsel %vm1173_vm13, %v1169_v42, %v1054_v30 }
 0x1fa   : > { %v1056_v39 = vpop.permute.xlu2 %1055 }
 0x1fd   : > { %v1078_v38 = vpop.permute.xlu0 %1077 }
 0x1fe   : > { %v1187_v45 = vsel %vm1182_vm14, %v1178_v43, %v1078_v38 }
 0x1ff   : > { %v1196_v46 = vsel %vm1191_vm15, %v1187_v45, %v1102_v32  ;;  %v1258_v27 = vpop.f32.mrf.mxu1 }
 0x200   : > { %v1001_v41 = vpop.permute.xlu1 %1000 }
 0x201   : > { %v1162_v57 = vsel %vm703_vm8, %v1154_v54, %v1001_v41 }
 0x202   : > { %v1058_v17 = vpop.permute.xlu2 %1057 }
 0x205   : > { %v929_v3 = vpop.permute.xlu0 %928 }
 0x206   : > { %v1147_v52 = vsel %vm667_vm4, %v2118_v28, %v929_v3 }
 0x207   : > { %v1155_v9 = vsel %vm685_vm6, %v1147_v52, %v978_v56  ;;  %v1261_v32 = vpop.f32.mrf.mxu1 }
 0x208   : > { %v1126_v6 = vpop.permute.xlu1 %1125 }
 0x209   : > { %v1205_v47 = vsel %vm1200_vm2, %v1196_v46, %v1126_v6 }
 0x20a   : > { %1460 = vmatmul.msk.f32.gmra.mxu2 %vm1279_vm5, %v1205_v47  ;;  %v1005_v50 = vpop.permute.xlu2 %1004 }
 0x20d   : > { %v1029_v48 = vpop.permute.xlu0 %1028 }
 0x20e   : > { %v1170_v60 = vsel %vm721_vm10, %v1162_v57, %v1029_v48 }
 0x20f   : > { %v1179_v62 = vsel %vm1173_vm13, %v1170_v60, %v1056_v39 }
 0x210   : > { %v1003_v49 = vpop.permute.xlu1 %1002 }
 0x211   : > { %v1163_v16 = vsel %vm703_vm8, %v1155_v9, %v1003_v49 }
 0x212   : > { %v1130_v33 = vpop.permute.xlu2 %1129 }
 0x215   : > { %v1031_v51 = vpop.permute.xlu0 %1030 }
 0x216   : > { %v1171_v28 = vsel %vm721_vm10, %v1163_v16, %v1031_v51 }
 0x217   : > { %v1180_v4 = vsel %vm1173_vm13, %v1171_v28, %v1058_v17 }
 0x218   : > { %v1080_v36 = vpop.permute.xlu1 %1079 }
 0x219   : > { %v1188_v63 = vsel %vm1182_vm14, %v1179_v62, %v1080_v36 }
 0x21a   : > { %v1128_v0 = vpop.permute.xlu2 %1127 }
 0x21d   : > { %v980_v53 = vpop.permute.xlu0 %979 }
 0x220   : > { %v931_v59 = vpop.permute.xlu1 %930 }
 0x221   : > { %v1148_v55 = vsel %vm667_vm4, %v2162_v61, %v931_v59 }
 0x222   : > { %v1156_v13 = vsel %vm685_vm6, %v1148_v55, %v980_v53 }
 0x223   : > { %v1164_v18 = vsel %vm703_vm8, %v1156_v13, %v1005_v50 }
 0x225   : > { %v1104_v8 = vpop.permute.xlu0 %1103 }
 0x226   : > { %v1197_v7 = vsel %vm1191_vm15, %v1188_v63, %v1104_v8 }
 0x227   : > { %v1206_v10 = vsel %vm1200_vm2, %v1197_v7, %v1128_v0 }
 0x228   : > { %1461 = vmatmul.msk.f32.gmra.mxu2 %vm1279_vm5, %v1206_v10  ;;  %v1082_v34 = vpop.permute.xlu1 %1081 }
 0x229   : > { %v1189_v5 = vsel %vm1182_vm14, %v1180_v4, %v1082_v34 }
 0x22d   : > { %v1106_v12 = vpop.permute.xlu0 %1105 }
 0x22e   : > { %v1198_v19 = vsel %vm1191_vm15, %v1189_v5, %v1106_v12 }
 0x22f   : > { %v1207_v14 = vsel %vm1200_vm2, %v1198_v19, %v1130_v33 }
 0x230   : > { %1462 = vmatmul.msk.f32.vlgmr.msra.gmra.mxu3 %vm1279_vm5, %v1207_v14  ;;  %v1033_v44 = vpop.permute.xlu1 %1032 }
 0x231   : > { %v1172_v37 = vsel %vm721_vm10, %v1164_v18, %v1033_v44 }
 0x235   : > { %v1060_v20 = vpop.permute.xlu0 %1059  ;;  %v1321_v21 = vpop.f32.mrf.mxu2 }
 0x236   : > { %v1322_v2 = vadd.f32 %v1321_v21, %v1255_v15  ;;  %v1181_v61 = vsel %vm1173_vm13, %v1172_v37, %v1060_v20 }
 0x237   : > { %v1190_v56 = vsel %vm1182_vm14, %v1181_v61, %v2091_v11  ;;  %v1264_v11 = vpop.f32.mrf.mxu1 }
 0x238   : > { %1345 = vst.msk [vmem:[%s2296_s25] sm:$0xff] %vm667_vm4, %v1322_v2  ;;  %v1108_v22 = vpop.permute.xlu1 %1107 }
 0x239   : > { %v1199_v24 = vsel %vm1191_vm15, %v1190_v56, %v1108_v22 }
 0x23d   : > { %v1132_v25 = vpop.permute.xlu0 %1131 }
 0x23e   : > { %v1208_v26 = vsel %vm1200_vm2, %v1199_v24, %v1132_v25 }
 0x23f   : > { %1463 = vmatmul.msk.f32.gmra.mxu3 %vm1279_vm5, %v1208_v26  ;;  %v1267_v38 = vpop.f32.mrf.mxu1 }
 0x247   : > { %v1270_v41 = vpop.f32.mrf.mxu1 }
 0x24a   : > { %v1324_v23 = vpop.f32.mrf.mxu2 }
 0x24b   : > { %v1325_v29 = vadd.f32 %v1324_v23, %v1258_v27 }
 0x24d   : > { %1346 = vst.msk [vmem:[%s2296_s25 + $0x8] sm:$0xff] %vm667_vm4, %v1325_v29 }
 0x24f   : > { %v1273_v45 = vpop.f32.mrf.mxu1 }
 0x257   : > { %v1276_v6 = vpop.f32.mrf.mxu1 }
 0x25e   : > { %v1327_v58 = vpop.f32.mrf.mxu2 }
 0x25f   : > { %v1328_v30 = vadd.f32 %v1327_v58, %v1261_v32 }
 0x261   : > { %1347 = vst.msk [vmem:[%s2296_s25 + $0x10] sm:$0xff] %vm667_vm4, %v1328_v30 }
 0x275   : > { %v1330_v31 = vpop.f32.mrf.mxu2 }
 0x276   : > { %v1331_v35 = vadd.f32 %v1330_v31, %v1264_v11 }
 0x278   : > { %1348 = vst.msk [vmem:[%s2296_s25 + $0x18] sm:$0xff] %vm667_vm4, %v1331_v35 }
 0x28d   : > { %v1333_v39 = vpop.f32.mrf.mxu2 }
 0x28e   : > { %v1334_v40 = vadd.f32 %v1333_v39, %v1267_v38 }
 0x290   : > { %1349 = vst.msk [vmem:[%s2296_s25 + $0x20] sm:$0xff] %vm667_vm4, %v1334_v40 }
 0x2ab   : > { %v1336_v42 = vpop.f32.mrf.mxu2 }
 0x2ac   : > { %v1337_v43 = vadd.f32 %v1336_v42, %v1270_v41 }
 0x2ae   : > { %1350 = vst.msk [vmem:[%s2296_s25 + $0x28] sm:$0xff] %vm667_vm4, %v1337_v43 }
 0x2b3   : > { %v1339_v3 = vpop.f32.mrf.mxu3 }
 0x2b4   : > { %v1340_v17 = vadd.f32 %v1339_v3, %v1273_v45 }
 0x2b6   : > { %1351 = vst.msk [vmem:[%s2296_s25 + $0x30] sm:$0xff] %vm667_vm4, %v1340_v17 }
 0x2c2   : > { %v1342_v46 = vpop.f32.mrf.mxu3 }
 0x2c3   : > { %v1343_v47 = vadd.f32 %v1342_v46, %v1276_v6 }
 0x2c5   : > { %1352 = vst.msk [vmem:[%s2296_s25 + $0x38] sm:$0xff] %vm667_vm4, %v1343_v47 }
 0x2c6   : > { %1564 = shalt.err (!%p1561_p3)
}
 0x2c7   : > { %s1614_s17 = smov 128  }
 0x2c8   : > { %1480 = dma.vmem_to_hbm [thread:$0]  (%p1698_p5), %s1367_s13, 1024, %s1369_s19, %s1354_s23, %s1614_s17, %s1614_s17, %s1604_s12  }
 0x2c9 PF: > { %p1486_p4 = scmp.ge.s32.totalorder %s1599_s30, 2  ;;  %s1383_s25 = sand.u32 1, %s1587_s27  }
 0x2ca   : > { %s1384_s10 = scalar_lea.sflag [#allocation3], %s1383_s25 }
 0x2cb   : > { %p1483_p7 = pnand %p1486_p4, %p1702_p6 }
 0x2cd   : > { %p1484_p8 = pneg %p1483_p7 }
 0x2cf   : > { %1582 = dma.done.wait (%p1484_p8), %s1384_s10, 1024  }
 0x2d0   : > { %1584 = vsyncadd (%p1484_p8), %s1384_s10, 4294966272  ;;  %p18_p9 = scmp.ge.s32.totalorder %s1685_s11, 4   ;;  %s2368_s27 = smov %s1591_s28 }
 0x2d1   : > { %s2369_s28 = smov %s1595_s29  ;;  %s2370_s29 = smov %s1696_s14 }
 0x2d2   : > { %s2371_s30 = smov %s1685_s11  ;;  %20 = sbr.rel (!%p18_p9) target bundleno = 3 (0x3), region = 87 }
 0x2d7   :  { %1390 = vsyncpa [#allocation3], 1 }
 0x2d8   :  { %1392 = vsyncpa [#allocation3 + $0x1], 1 }

</bundles_post_ra>
